<compile_context>
chip_gen: v7x
topology: tpu7x:2x2x1
jax: 0.10.0
libtpu: 0.0.40
codegen_flags: <defaults>
</compile_context>

<pallas_src>
import functools

import jax
import jax.numpy as jnp
from jax.experimental import pallas as pl
from jax.experimental.pallas import tpu as pltpu


XQ_PAD = 8  # query-image channels padded 3 -> 8 so the tiny pooling/gate matmuls keep K>=8


# --------------------------------------------------------------------------
# Fused per-scene kernel: encoder + STRN routing + scene fusion + DRAW
# --------------------------------------------------------------------------

def _strgqn_kernel(
    # per-scene activations
    patches_ref,   # (n_obs*n_view, 3*ds*ds)   observation patches of this scene
    xqp_ref,       # (n_view, 3*ds*ds)         query-image patches of this scene
    pool_ref,      # (3*ds*ds, XQ_PAD)  bf16   avg-pool-as-matmul (zero padded cols 3..)
    enc_w_ref,     # (3*ds*ds, csize)   bf16
    enc_b_ref,     # (1, csize)
    v_all_ref,     # (n_obs+1, vsize)          obs poses then the query pose of this scene
    pw1_ref,       # (vsize, pose_hidden) bf16
    pb1_ref,       # (1, pose_hidden)
    pw2_ref,       # (pose_hidden, e_dim) bf16
    pb2_ref,       # (1, e_dim)
    vcode_ref,     # (n_view, e_dim)    bf16
    wcode_t_ref,   # (e_dim, n_wrd)     bf16   pre-transposed world-cell codes (lane=n_wrd)
    eps_ref,       # (L, n_view, zdim)
    # DRAW per-layer weights stacked on a leading L axis (bf16 except biases)
    inf_wx_ref,    # (L, XQ_PAD, 4*ch)
    inf_wr_ref,    # (L, csize, 4*ch)
    inf_wh_ref,    # (L, ch, 4*ch)
    inf_b_ref,     # (L, 1, 4*ch)
    q_w_ref,       # (L, ch, 2*zdim)
    q_b_ref,       # (L, 1, 2*zdim)
    p_w_ref,       # (L, ch, 2*zdim)
    p_b_ref,       # (L, 1, 2*zdim)
    gen_wz_ref,    # (L, zdim, 4*ch)
    gen_wr_ref,    # (L, csize, 4*ch)
    gen_b_ref,     # (L, 1, 4*ch)
    u_w_ref,       # (L, ch, ch)
    u_b_ref,       # (L, 1, ch)
    out_w_ref,     # (ch, 3*ds*ds)      bf16
    out_b_ref,     # (1, 3*ds*ds)
    # outputs (per-scene blocks)
    pix_ref,       # (n_view, 3*ds*ds)  sigmoid already applied
    kl_ref,        # (n_view, zdim)
    *, n_obs, n_view, n_wrd, ch, zdim, layers,
):
    f32 = jnp.float32
    bf16 = jnp.bfloat16

    def bdot(a, b):
        # bf16 MXU matmul, f32 accumulation
        return jnp.dot(a.astype(bf16), b.astype(bf16), preferred_element_type=f32)

    def bdot_g(a, b, dims):
        return jax.lax.dot_general(a.astype(bf16), b.astype(bf16),
                                   (dims, ((), ())), preferred_element_type=f32)

    # ---------------- encoder: patch embedding for all observations of this scene ----------
    feat = bdot(patches_ref[...], enc_w_ref[...]) + enc_b_ref[...]         # (n_obs*n_view, csize)

    # ---------------- STRN pose MLP (observations + query in one matmul) -------------------
    hid = jnp.maximum(bdot(v_all_ref[...], pw1_ref[...]) + pb1_ref[...], 0.0)
    g = bdot(hid, pw2_ref[...]) + pb2_ref[...]                             # (n_obs+1, e_dim)

    # ---------------- batched routing logits: lane axis = n_wrd ----------------------------
    vcode = vcode_ref[...].astype(f32)                                     # (n_view, e_dim)
    a_all = (vcode[None, :, :] * g[:, None, :]).reshape((n_obs + 1) * n_view, -1)
    logits = bdot(a_all, wcode_t_ref[...])                                 # ((n_obs+1)*n_view, n_wrd)

    # observation routing: per-obs softmax over the view axis (sublane-grouped reduce)
    lo = logits[:n_obs * n_view, :].reshape(n_obs, n_view, n_wrd)
    lo = lo - jnp.max(lo, axis=1, keepdims=True)
    e = jnp.exp(lo)
    route_o = e * pl.reciprocal(jnp.sum(e, axis=1, keepdims=True), approx=True)
    route_o = route_o.reshape(n_obs * n_view, n_wrd)                       # (n_obs*n_view, n_wrd)

    # scene fusion: sum over observations folded into one contraction; lane-dense sigmoid
    scene = jax.nn.sigmoid(bdot_g(feat, route_o, ((0,), (0,))))            # (csize, n_wrd)

    # query routing: softmax over world cells (full 128-lane reduce)
    lq = logits[n_obs * n_view:, :]                                        # (n_view, n_wrd)
    lq = lq - jnp.max(lq, axis=1, keepdims=True)
    eq = jnp.exp(lq)
    route_q = eq * pl.reciprocal(jnp.sum(eq, axis=1, keepdims=True), approx=True)
    r = bdot_g(route_q, scene, ((1,), (1,)))                               # (n_view, csize)

    # ---------------- query image downsample (avg-pool expressed as a matmul) --------------
    xq_flat = bdot(xqp_ref[...], pool_ref[...])                            # (n_view, XQ_PAD)

    # ---------------- DRAW recurrence: all layers fused, state stays in vregs --------------
    h_g = jnp.zeros((n_view, ch), f32)
    c_g = jnp.zeros((n_view, ch), f32)
    c_i = jnp.zeros((n_view, ch), f32)
    u = jnp.zeros((n_view, ch), f32)
    kl = jnp.zeros((n_view, zdim), f32)

    def lstm(gates, c):
        # one sigmoid over 3*ch lanes + one tanh, then slice (halves EUP pushes)
        sg = jax.nn.sigmoid(gates[:, :3 * ch])
        u_g = jnp.tanh(gates[:, 3 * ch:])
        i_g = sg[:, 0 * ch:1 * ch]
        f_g = sg[:, 1 * ch:2 * ch]
        o_g = sg[:, 2 * ch:3 * ch]
        c_new = f_g * c + i_g * u_g
        return o_g * jnp.tanh(c_new), c_new

    for l in range(layers):  # short, static -> unrolled
        # inference core (split matmuls avoid an in-kernel lane concatenation)
        gates_i = (bdot(xq_flat, inf_wx_ref[l]) + bdot(r, inf_wr_ref[l])
                   + bdot(h_g, inf_wh_ref[l]) + inf_b_ref[l])
        h_i, c_i = lstm(gates_i, c_i)
        # posterior / prior
        q = bdot(h_i, q_w_ref[l]) + q_b_ref[l]
        mu_q, lv_q = q[:, :zdim], q[:, zdim:]
        p = bdot(h_g, p_w_ref[l]) + p_b_ref[l]
        mu_p, lv_p = p[:, :zdim], p[:, zdim:]
        # reparameterized sample
        z = mu_q + jnp.exp(0.5 * lv_q) * eps_ref[l]
        # generator core
        gates_g = bdot(z, gen_wz_ref[l]) + bdot(r, gen_wr_ref[l]) + gen_b_ref[l]
        h_g, c_g = lstm(gates_g, c_g)
        # canvas + KL accumulation
        u = u + bdot(h_g, u_w_ref[l]) + u_b_ref[l]
        kl = kl + 0.5 * (lv_p - lv_q
                         + (jnp.exp(lv_q) + (mu_q - mu_p) ** 2) * jnp.exp(-lv_p) - 1.0)

    # ---------------- output projection with fused sigmoid epilogue ------------------------
    pix = bdot(u, out_w_ref[...]) + out_b_ref[...]
    pix_ref[...] = jax.nn.sigmoid(pix)
    kl_ref[...] = kl


# --------------------------------------------------------------------------
# Model parameters and wrapper (wrapper ops are layout plumbing only)
# --------------------------------------------------------------------------

CFG = dict(
    n_wrd_cells=128,     # world cells (small synthetic size)
    view_size=(4, 4),    # encoder output spatial grid
    csize=32,            # representation channels
    ch=16,               # generator hidden channels
    vsize=7,             # camera pose dim
    draw_layers=2,       # DRAW steps
    down_size=4,         # encoder downsample / generator upsample factor
    zdim=8,              # latent channels
    e_dim=32,            # STRN cell-code embedding dim
    pose_hidden=64,      # STRN pose-MLP hidden dim
)


def init_params(key, cfg):
    def nrm(k, shape, scale=0.1):
        return scale * jax.random.normal(k, shape, dtype=jnp.float32)

    ks = iter(jax.random.split(key, 64))
    ds, cs, ch, zd = cfg['down_size'], cfg['csize'], cfg['ch'], cfg['zdim']
    L = cfg['draw_layers']
    n_view = cfg['view_size'][0] * cfg['view_size'][1]
    return {
        'enc_w': nrm(next(ks), (3 * ds * ds, cs)),
        'enc_b': nrm(next(ks), (cs,)),
        'pose_w1': nrm(next(ks), (cfg['vsize'], cfg['pose_hidden'])),
        'pose_b1': nrm(next(ks), (cfg['pose_hidden'],)),
        'pose_w2': nrm(next(ks), (cfg['pose_hidden'], cfg['e_dim'])),
        'pose_b2': nrm(next(ks), (cfg['e_dim'],)),
        'view_code': nrm(next(ks), (n_view, cfg['e_dim']), 1.0),
        'wrd_code': nrm(next(ks), (cfg['n_wrd_cells'], cfg['e_dim']), 1.0),
        'out_w': nrm(next(ks), (ch, 3 * ds * ds)),
        'out_b': nrm(next(ks), (3 * ds * ds,)),
        # DRAW per-layer weights stacked on a leading layer axis.
        # inf_wx rows 3..XQ_PAD-1 multiply zero-padded inputs -> no effect on semantics.
        'inf_wx': nrm(next(ks), (L, XQ_PAD, 4 * ch)),
        'inf_wr': nrm(next(ks), (L, cs, 4 * ch)),
        'inf_wh': nrm(next(ks), (L, ch, 4 * ch)),
        'inf_b': nrm(next(ks), (L, 1, 4 * ch)),
        'q_w': nrm(next(ks), (L, ch, 2 * zd)),
        'q_b': nrm(next(ks), (L, 1, 2 * zd)),
        'p_w': nrm(next(ks), (L, ch, 2 * zd)),
        'p_b': nrm(next(ks), (L, 1, 2 * zd)),
        'gen_wz': nrm(next(ks), (L, zd, 4 * ch)),
        'gen_wr': nrm(next(ks), (L, cs, 4 * ch)),
        'gen_b': nrm(next(ks), (L, 1, 4 * ch)),
        'u_w': nrm(next(ks), (L, ch, ch)),
        'u_b': nrm(next(ks), (L, 1, ch)),
    }


def strgqn_forward(params, x, v, xq, vq, key, *, n_obs, cfg):
    hh, ww = cfg['view_size']
    n_view = hh * ww
    ds = cfg['down_size']
    cs, ch, zd, L = cfg['csize'], cfg['ch'], cfg['zdim'], cfg['draw_layers']
    nw = cfg['n_wrd_cells']
    B = x.shape[0]
    S = xq.shape[0]
    # scene fusion assumes observations of a scene are contiguous in the batch
    assert B == S * n_obs, "batch must be S scenes x n_obs contiguous observations"
    H, W = x.shape[2], x.shape[3]
    M = S * n_view

    def to_patches(img):
        n = img.shape[0]
        return (img.reshape(n, 3, hh, ds, ww, ds)
                   .transpose(0, 2, 4, 1, 3, 5)
                   .reshape(n * hh * ww, 3 * ds * ds))

    patches = to_patches(x)                                    # (B*n_view, 3*ds*ds)
    xqp = to_patches(xq)                                       # (S*n_view, 3*ds*ds)

    # average-pool expressed as a matmul; output channels zero-padded to XQ_PAD lanes
    pool = jnp.repeat(jnp.eye(3, dtype=jnp.float32), ds * ds, axis=0) / float(ds * ds)
    pool = jnp.pad(pool, ((0, 0), (0, XQ_PAD - 3)))            # (3*ds*ds, XQ_PAD)

    # per-scene poses: [obs_0 .. obs_{n_obs-1}, query]
    v_all = jnp.concatenate(
        [v.reshape(S, n_obs, -1), vq.reshape(S, 1, -1)], axis=1)  # (S, n_obs+1, vsize)

    eps = jax.random.normal(key, (L, M, zd), jnp.float32)

    bf = lambda a: a.astype(jnp.bfloat16)
    row = lambda b: b.reshape(1, -1)

    # pre-transposed world-cell codes: lane axis = n_wrd everywhere in the kernel
    wcode_t = bf(params['wrd_code'].T)                         # (e_dim, n_wrd)

    kernel = functools.partial(
        _strgqn_kernel,
        n_obs=n_obs, n_view=n_view, n_wrd=nw, ch=ch, zdim=zd, layers=L)

    def const_spec(arr):
        # full-shape block, constant block index -> weight stays resident across scenes
        return pl.BlockSpec(arr.shape, lambda s, _n=arr.ndim: (0,) * _n)

    # (array, per-scene BlockSpec or None for a resident constant), in kernel-arg order
    inputs = [
        (patches, pl.BlockSpec((n_obs * n_view, 3 * ds * ds), lambda s: (s, 0))),
        (xqp, pl.BlockSpec((n_view, 3 * ds * ds), lambda s: (s, 0))),
        (bf(pool), None),
        (bf(params['enc_w']), None),
        (row(params['enc_b']), None),
        (v_all, pl.BlockSpec((None, n_obs + 1, cfg['vsize']), lambda s: (s, 0, 0))),
        (bf(params['pose_w1']), None),
        (row(params['pose_b1']), None),
        (bf(params['pose_w2']), None),
        (row(params['pose_b2']), None),
        (bf(params['view_code']), None),
        (wcode_t, None),
        (eps, pl.BlockSpec((L, n_view, zd), lambda s: (0, s, 0))),
        (bf(params['inf_wx']), None),
        (bf(params['inf_wr']), None),
        (bf(params['inf_wh']), None),
        (params['inf_b'], None),
        (bf(params['q_w']), None),
        (params['q_b'], None),
        (bf(params['p_w']), None),
        (params['p_b'], None),
        (bf(params['gen_wz']), None),
        (bf(params['gen_wr']), None),
        (params['gen_b'], None),
        (bf(params['u_w']), None),
        (params['u_b'], None),
        (bf(params['out_w']), None),
        (row(params['out_b']), None),
    ]
    args = [a for a, _ in inputs]
    in_specs = [spec if spec is not None else const_spec(a) for a, spec in inputs]

    out_specs = [
        pl.BlockSpec((n_view, 3 * ds * ds), lambda s: (s, 0)),
        pl.BlockSpec((n_view, zd), lambda s: (s, 0)),
    ]
    out_shape = (jax.ShapeDtypeStruct((M, 3 * ds * ds), jnp.float32),
                 jax.ShapeDtypeStruct((M, zd), jnp.float32))

    pix, kl = pl.pallas_call(
        kernel,
        out_shape=out_shape,
        grid_spec=pltpu.PrefetchScalarGridSpec(
            num_scalar_prefetch=0,
            grid=(S,),
            in_specs=in_specs,
            out_specs=out_specs),
        compiler_params=pltpu.CompilerParams(
            dimension_semantics=("parallel",)),   # scenes are independent -> both TCs on v7x
    )(*args)

    # pixel-shuffle back to NCHW (pure layout plumbing)
    x_query = (pix.reshape(S, hh, ww, 3, ds, ds)
                  .transpose(0, 3, 1, 4, 2, 5)
                  .reshape(S, 3, H, W))
    kl = kl.reshape(S, hh, ww, zd).transpose(0, 3, 1, 2)       # (S, zdim, h, w)
    return x_query, kl


# --------------------------------------------------------------------------
# Driver
# --------------------------------------------------------------------------

if __name__ == "__main__":
    cfg = CFG
    key = jax.random.PRNGKey(0)
    k_param, k_x, k_v, k_xq, k_vq, k_gen = jax.random.split(key, 6)

    params = init_params(k_param, cfg)

    n_obs = 3
    S = 2                                          # number of scenes
    B = S * n_obs                                  # number of observations
    H = cfg['view_size'][0] * cfg['down_size']     # 16

    x = jax.random.normal(k_x, (B, 3, H, H), dtype=jnp.float32)
    v = jax.random.normal(k_v, (B, cfg['vsize']), dtype=jnp.float32)
    xq = jax.random.uniform(k_xq, (S, 3, H, H), dtype=jnp.float32)
    vq = jax.random.normal(k_vq, (S, cfg['vsize']), dtype=jnp.float32)

    fwd = jax.jit(functools.partial(strgqn_forward, n_obs=n_obs, cfg=cfg))
    x_query, kl = fwd(params, x, v, xq, vq, k_gen)   # key is a traced argument
    jax.block_until_ready((x_query, kl))

    assert x_query.shape == (S, 3, H, H), x_query.shape
    assert kl.shape == (S, cfg['zdim'], cfg['view_size'][0], cfg['view_size'][1]), kl.shape
    assert bool(jnp.all(jnp.isfinite(x_query))) and bool(jnp.all(jnp.isfinite(kl)))
    print("KERNEL_OK")
</pallas_src>

<mosaic_0001>
module attributes {stable_mosaic.version = 11 : i64} {
  func.func @_strgqn_kernel(%arg0: i32, %arg1: memref<48x48xf32, #tpu.memory_space<vmem>>, %arg2: memref<16x48xf32, #tpu.memory_space<vmem>>, %arg3: memref<48x8xbf16, #tpu.memory_space<vmem>>, %arg4: memref<48x32xbf16, #tpu.memory_space<vmem>>, %arg5: memref<1x32xf32, #tpu.memory_space<vmem>>, %arg6: memref<1x4x7xf32, #tpu.memory_space<vmem>>, %arg7: memref<7x64xbf16, #tpu.memory_space<vmem>>, %arg8: memref<1x64xf32, #tpu.memory_space<vmem>>, %arg9: memref<64x32xbf16, #tpu.memory_space<vmem>>, %arg10: memref<1x32xf32, #tpu.memory_space<vmem>>, %arg11: memref<16x32xbf16, #tpu.memory_space<vmem>>, %arg12: memref<32x128xbf16, #tpu.memory_space<vmem>>, %arg13: memref<2x16x8xf32, #tpu.memory_space<vmem>>, %arg14: memref<2x8x64xbf16, #tpu.memory_space<vmem>>, %arg15: memref<2x32x64xbf16, #tpu.memory_space<vmem>>, %arg16: memref<2x16x64xbf16, #tpu.memory_space<vmem>>, %arg17: memref<2x1x64xf32, #tpu.memory_space<vmem>>, %arg18: memref<2x16x16xbf16, #tpu.memory_space<vmem>>, %arg19: memref<2x1x16xf32, #tpu.memory_space<vmem>>, %arg20: memref<2x16x16xbf16, #tpu.memory_space<vmem>>, %arg21: memref<2x1x16xf32, #tpu.memory_space<vmem>>, %arg22: memref<2x8x64xbf16, #tpu.memory_space<vmem>>, %arg23: memref<2x32x64xbf16, #tpu.memory_space<vmem>>, %arg24: memref<2x1x64xf32, #tpu.memory_space<vmem>>, %arg25: memref<2x16x16xbf16, #tpu.memory_space<vmem>>, %arg26: memref<2x1x16xf32, #tpu.memory_space<vmem>>, %arg27: memref<16x48xbf16, #tpu.memory_space<vmem>>, %arg28: memref<1x48xf32, #tpu.memory_space<vmem>>, %arg29: memref<16x48xf32, #tpu.memory_space<vmem>>, %arg30: memref<16x8xf32, #tpu.memory_space<vmem>>) attributes {dimension_semantics = [#tpu.dimension_semantics<parallel>], iteration_bounds = array<i64: 2>, scalar_prefetch = 0 : i64, scratch_operands = 0 : i64, tpu.core_type = #tpu.core_type<tc>, window_params = [{transform_indices = @transform_0, window_bounds = array<i64: 48, 48>}, {transform_indices = @transform_1, window_bounds = array<i64: 16, 48>}, {pipeline_mode = #tpu.pipeline_mode<synchronous>, transform_indices = @transform_2, window_bounds = array<i64: 48, 8>}, {pipeline_mode = #tpu.pipeline_mode<synchronous>, transform_indices = @transform_3, window_bounds = array<i64: 48, 32>}, {pipeline_mode = #tpu.pipeline_mode<synchronous>, transform_indices = @transform_4, window_bounds = array<i64: 1, 32>}, {transform_indices = @transform_5, window_bounds = array<i64: 1, 4, 7>}, {pipeline_mode = #tpu.pipeline_mode<synchronous>, transform_indices = @transform_6, window_bounds = array<i64: 7, 64>}, {pipeline_mode = #tpu.pipeline_mode<synchronous>, transform_indices = @transform_7, window_bounds = array<i64: 1, 64>}, {pipeline_mode = #tpu.pipeline_mode<synchronous>, transform_indices = @transform_8, window_bounds = array<i64: 64, 32>}, {pipeline_mode = #tpu.pipeline_mode<synchronous>, transform_indices = @transform_9, window_bounds = array<i64: 1, 32>}, {pipeline_mode = #tpu.pipeline_mode<synchronous>, transform_indices = @transform_10, window_bounds = array<i64: 16, 32>}, {pipeline_mode = #tpu.pipeline_mode<synchronous>, transform_indices = @transform_11, window_bounds = array<i64: 32, 128>}, {transform_indices = @transform_12, window_bounds = array<i64: 2, 16, 8>}, {pipeline_mode = #tpu.pipeline_mode<synchronous>, transform_indices = @transform_13, window_bounds = array<i64: 2, 8, 64>}, {pipeline_mode = #tpu.pipeline_mode<synchronous>, transform_indices = @transform_14, window_bounds = array<i64: 2, 32, 64>}, {pipeline_mode = #tpu.pipeline_mode<synchronous>, transform_indices = @transform_15, window_bounds = array<i64: 2, 16, 64>}, {pipeline_mode = #tpu.pipeline_mode<synchronous>, transform_indices = @transform_16, window_bounds = array<i64: 2, 1, 64>}, {pipeline_mode = #tpu.pipeline_mode<synchronous>, transform_indices = @transform_17, window_bounds = array<i64: 2, 16, 16>}, {pipeline_mode = #tpu.pipeline_mode<synchronous>, transform_indices = @transform_18, window_bounds = array<i64: 2, 1, 16>}, {pipeline_mode = #tpu.pipeline_mode<synchronous>, transform_indices = @transform_19, window_bounds = array<i64: 2, 16, 16>}, {pipeline_mode = #tpu.pipeline_mode<synchronous>, transform_indices = @transform_20, window_bounds = array<i64: 2, 1, 16>}, {pipeline_mode = #tpu.pipeline_mode<synchronous>, transform_indices = @transform_21, window_bounds = array<i64: 2, 8, 64>}, {pipeline_mode = #tpu.pipeline_mode<synchronous>, transform_indices = @transform_22, window_bounds = array<i64: 2, 32, 64>}, {pipeline_mode = #tpu.pipeline_mode<synchronous>, transform_indices = @transform_23, window_bounds = array<i64: 2, 1, 64>}, {pipeline_mode = #tpu.pipeline_mode<synchronous>, transform_indices = @transform_24, window_bounds = array<i64: 2, 16, 16>}, {pipeline_mode = #tpu.pipeline_mode<synchronous>, transform_indices = @transform_25, window_bounds = array<i64: 2, 1, 16>}, {pipeline_mode = #tpu.pipeline_mode<synchronous>, transform_indices = @transform_26, window_bounds = array<i64: 16, 48>}, {pipeline_mode = #tpu.pipeline_mode<synchronous>, transform_indices = @transform_27, window_bounds = array<i64: 1, 48>}, {transform_indices = @transform_28, window_bounds = array<i64: 16, 48>}, {transform_indices = @transform_29, window_bounds = array<i64: 16, 8>}]} {
    %c0 = arith.constant 0 : index
    %c0_0 = arith.constant 0 : index
    %0 = vector.load %arg1[%c0, %c0_0] : memref<48x48xf32, #tpu.memory_space<vmem>>, vector<48x48xf32>
    %c0_1 = arith.constant 0 : index
    %c0_2 = arith.constant 0 : index
    %1 = vector.load %arg4[%c0_1, %c0_2] : memref<48x32xbf16, #tpu.memory_space<vmem>>, vector<48x32xbf16>
    %2 = arith.truncf %0 : vector<48x48xf32> to vector<48x48xbf16>
    %cst = arith.constant dense<0.000000e+00> : vector<48x32xf32>
    %3 = tpu.matmul %2, %1, %cst {dimension_numbers = #tpu.dot_dimension_numbers<[1], [0], [0], [1], [0, 0, 1, 1], [], []>} : vector<48x48xbf16>, vector<48x32xbf16>, vector<48x32xf32> -> vector<48x32xf32>
    %c0_3 = arith.constant 0 : index
    %c0_4 = arith.constant 0 : index
    %4 = vector.load %arg5[%c0_3, %c0_4] : memref<1x32xf32, #tpu.memory_space<vmem>>, vector<1x32xf32>
    %5 = vector.broadcast %4 : vector<1x32xf32> to vector<48x32xf32>
    %6 = arith.addf %3, %5 : vector<48x32xf32>
    %c0_5 = arith.constant 0 : index
    %c0_6 = arith.constant 0 : index
    %c0_7 = arith.constant 0 : index
    %7 = vector.load %arg6[%c0_5, %c0_6, %c0_7] : memref<1x4x7xf32, #tpu.memory_space<vmem>>, vector<1x4x7xf32>
    %8 = vector.shape_cast %7 : vector<1x4x7xf32> to vector<4x7xf32>
    %c0_8 = arith.constant 0 : index
    %c0_9 = arith.constant 0 : index
    %9 = vector.load %arg7[%c0_8, %c0_9] : memref<7x64xbf16, #tpu.memory_space<vmem>>, vector<7x64xbf16>
    %10 = arith.truncf %8 : vector<4x7xf32> to vector<4x7xbf16>
    %cst_10 = arith.constant dense<0.000000e+00> : vector<4x64xf32>
    %11 = tpu.matmul %10, %9, %cst_10 {dimension_numbers = #tpu.dot_dimension_numbers<[1], [0], [0], [1], [0, 0, 1, 1], [], []>} : vector<4x7xbf16>, vector<7x64xbf16>, vector<4x64xf32> -> vector<4x64xf32>
    %c0_11 = arith.constant 0 : index
    %c0_12 = arith.constant 0 : index
    %12 = vector.load %arg8[%c0_11, %c0_12] : memref<1x64xf32, #tpu.memory_space<vmem>>, vector<1x64xf32>
    %13 = vector.broadcast %12 : vector<1x64xf32> to vector<4x64xf32>
    %14 = arith.addf %11, %13 : vector<4x64xf32>
    %cst_13 = arith.constant 0.000000e+00 : f32
    %15 = vector.broadcast %cst_13 : f32 to vector<4x64xf32>
    %16 = arith.maximumf %14, %15 : vector<4x64xf32>
    %c0_14 = arith.constant 0 : index
    %c0_15 = arith.constant 0 : index
    %17 = vector.load %arg9[%c0_14, %c0_15] : memref<64x32xbf16, #tpu.memory_space<vmem>>, vector<64x32xbf16>
    %18 = arith.truncf %16 : vector<4x64xf32> to vector<4x64xbf16>
    %cst_16 = arith.constant dense<0.000000e+00> : vector<4x32xf32>
    %19 = tpu.matmul %18, %17, %cst_16 {dimension_numbers = #tpu.dot_dimension_numbers<[1], [0], [0], [1], [0, 0, 1, 1], [], []>} : vector<4x64xbf16>, vector<64x32xbf16>, vector<4x32xf32> -> vector<4x32xf32>
    %c0_17 = arith.constant 0 : index
    %c0_18 = arith.constant 0 : index
    %20 = vector.load %arg10[%c0_17, %c0_18] : memref<1x32xf32, #tpu.memory_space<vmem>>, vector<1x32xf32>
    %21 = vector.broadcast %20 : vector<1x32xf32> to vector<4x32xf32>
    %22 = arith.addf %19, %21 : vector<4x32xf32>
    %c0_19 = arith.constant 0 : index
    %c0_20 = arith.constant 0 : index
    %23 = vector.load %arg11[%c0_19, %c0_20] : memref<16x32xbf16, #tpu.memory_space<vmem>>, vector<16x32xbf16>
    %24 = arith.extf %23 : vector<16x32xbf16> to vector<16x32xf32>
    %25 = vector.shape_cast %24 : vector<16x32xf32> to vector<1x16x32xf32>
    %26 = vector.shape_cast %22 : vector<4x32xf32> to vector<4x1x32xf32>
    %27 = vector.broadcast %25 : vector<1x16x32xf32> to vector<4x16x32xf32>
    %28 = vector.broadcast %26 : vector<4x1x32xf32> to vector<4x16x32xf32>
    %29 = arith.mulf %27, %28 : vector<4x16x32xf32>
    %30 = vector.shape_cast %29 : vector<4x16x32xf32> to vector<64x32xf32>
    %c0_21 = arith.constant 0 : index
    %c0_22 = arith.constant 0 : index
    %31 = vector.load %arg12[%c0_21, %c0_22] : memref<32x128xbf16, #tpu.memory_space<vmem>>, vector<32x128xbf16>
    %32 = arith.truncf %30 : vector<64x32xf32> to vector<64x32xbf16>
    %cst_23 = arith.constant dense<0.000000e+00> : vector<64x128xf32>
    %33 = tpu.matmul %32, %31, %cst_23 {dimension_numbers = #tpu.dot_dimension_numbers<[1], [0], [0], [1], [0, 0, 1, 1], [], []>} : vector<64x32xbf16>, vector<32x128xbf16>, vector<64x128xf32> -> vector<64x128xf32>
    %34 = vector.extract_strided_slice %33 {offsets = [0, 0], sizes = [48, 128], strides = [1, 1]} : vector<64x128xf32> to vector<48x128xf32>
    %35 = vector.shape_cast %34 : vector<48x128xf32> to vector<3x16x128xf32>
    %cst_24 = arith.constant dense<0xFF800000> : vector<3x128xf32>
    %36 = vector.multi_reduction <maximumf>, %35, %cst_24 [1] : vector<3x16x128xf32> to vector<3x128xf32>
    %37 = vector.shape_cast %36 : vector<3x128xf32> to vector<3x1x128xf32>
    %38 = vector.broadcast %37 : vector<3x1x128xf32> to vector<3x16x128xf32>
    %39 = arith.subf %35, %38 : vector<3x16x128xf32>
    %40 = math.exp %39 : vector<3x16x128xf32>
    %cst_25 = arith.constant dense<0.000000e+00> : vector<3x128xf32>
    %41 = vector.multi_reduction <add>, %40, %cst_25 [1] : vector<3x16x128xf32> to vector<3x128xf32>
    %42 = vector.shape_cast %41 : vector<3x128xf32> to vector<3x1x128xf32>
    %43 = tpu.reciprocal %42 {approx = true} : vector<3x1x128xf32> -> vector<3x1x128xf32>
    %44 = vector.broadcast %43 : vector<3x1x128xf32> to vector<3x16x128xf32>
    %45 = arith.mulf %40, %44 : vector<3x16x128xf32>
    %46 = vector.shape_cast %45 : vector<3x16x128xf32> to vector<48x128xf32>
    %47 = arith.truncf %6 : vector<48x32xf32> to vector<48x32xbf16>
    %48 = arith.truncf %46 : vector<48x128xf32> to vector<48x128xbf16>
    %cst_26 = arith.constant dense<0.000000e+00> : vector<32x128xf32>
    %49 = tpu.matmul %47, %48, %cst_26 {dimension_numbers = #tpu.dot_dimension_numbers<[0], [0], [1], [1], [0, 1, 1, 1], [], []>} : vector<48x32xbf16>, vector<48x128xbf16>, vector<32x128xf32> -> vector<32x128xf32>
    %50 = arith.negf %49 : vector<32x128xf32>
    %51 = math.exp %50 : vector<32x128xf32>
    %cst_27 = arith.constant 1.000000e+00 : f32
    %52 = vector.broadcast %cst_27 : f32 to vector<32x128xf32>
    %53 = arith.addf %52, %51 : vector<32x128xf32>
    %54 = arith.divf %52, %53 : vector<32x128xf32>
    %55 = vector.extract_strided_slice %33 {offsets = [48, 0], sizes = [16, 128], strides = [1, 1]} : vector<64x128xf32> to vector<16x128xf32>
    %cst_28 = arith.constant dense<0xFF800000> : vector<16xf32>
    %56 = vector.multi_reduction <maximumf>, %55, %cst_28 [1] : vector<16x128xf32> to vector<16xf32>
    %57 = vector.shape_cast %56 : vector<16xf32> to vector<16x1xf32>
    %58 = vector.broadcast %57 : vector<16x1xf32> to vector<16x128xf32>
    %59 = arith.subf %55, %58 : vector<16x128xf32>
    %60 = math.exp %59 : vector<16x128xf32>
    %cst_29 = arith.constant dense<0.000000e+00> : vector<16xf32>
    %61 = vector.multi_reduction <add>, %60, %cst_29 [1] : vector<16x128xf32> to vector<16xf32>
    %62 = vector.shape_cast %61 : vector<16xf32> to vector<16x1xf32>
    %63 = tpu.reciprocal %62 {approx = true} : vector<16x1xf32> -> vector<16x1xf32>
    %64 = vector.broadcast %63 : vector<16x1xf32> to vector<16x128xf32>
    %65 = arith.mulf %60, %64 : vector<16x128xf32>
    %66 = arith.truncf %65 : vector<16x128xf32> to vector<16x128xbf16>
    %67 = arith.truncf %54 : vector<32x128xf32> to vector<32x128xbf16>
    %cst_30 = arith.constant dense<0.000000e+00> : vector<16x32xf32>
    %68 = tpu.matmul %66, %67, %cst_30 {dimension_numbers = #tpu.dot_dimension_numbers<[1], [1], [0], [0], [0, 0, 1, 0], [], []>} : vector<16x128xbf16>, vector<32x128xbf16>, vector<16x32xf32> -> vector<16x32xf32>
    %c0_31 = arith.constant 0 : index
    %c0_32 = arith.constant 0 : index
    %69 = vector.load %arg2[%c0_31, %c0_32] : memref<16x48xf32, #tpu.memory_space<vmem>>, vector<16x48xf32>
    %c0_33 = arith.constant 0 : index
    %c0_34 = arith.constant 0 : index
    %70 = vector.load %arg3[%c0_33, %c0_34] : memref<48x8xbf16, #tpu.memory_space<vmem>>, vector<48x8xbf16>
    %71 = arith.truncf %69 : vector<16x48xf32> to vector<16x48xbf16>
    %cst_35 = arith.constant dense<0.000000e+00> : vector<16x8xf32>
    %72 = tpu.matmul %71, %70, %cst_35 {dimension_numbers = #tpu.dot_dimension_numbers<[1], [0], [0], [1], [0, 0, 1, 1], [], []>} : vector<16x48xbf16>, vector<48x8xbf16>, vector<16x8xf32> -> vector<16x8xf32>
    %cst_36 = arith.constant 0.000000e+00 : f32
    %73 = vector.broadcast %cst_36 : f32 to vector<16x16xf32>
    %cst_37 = arith.constant 0.000000e+00 : f32
    %74 = vector.broadcast %cst_37 : f32 to vector<16x16xf32>
    %cst_38 = arith.constant 0.000000e+00 : f32
    %75 = vector.broadcast %cst_38 : f32 to vector<16x16xf32>
    %cst_39 = arith.constant 0.000000e+00 : f32
    %76 = vector.broadcast %cst_39 : f32 to vector<16x16xf32>
    %cst_40 = arith.constant 0.000000e+00 : f32
    %77 = vector.broadcast %cst_40 : f32 to vector<16x8xf32>
    %c0_41 = arith.constant 0 : index
    %c0_42 = arith.constant 0 : index
    %c0_43 = arith.constant 0 : index
    %78 = vector.load %arg14[%c0_41, %c0_42, %c0_43] : memref<2x8x64xbf16, #tpu.memory_space<vmem>>, vector<1x8x64xbf16>
    %79 = vector.shape_cast %78 : vector<1x8x64xbf16> to vector<8x64xbf16>
    %80 = arith.truncf %72 : vector<16x8xf32> to vector<16x8xbf16>
    %cst_44 = arith.constant dense<0.000000e+00> : vector<16x64xf32>
    %81 = tpu.matmul %80, %79, %cst_44 {dimension_numbers = #tpu.dot_dimension_numbers<[1], [0], [0], [1], [0, 0, 1, 1], [], []>} : vector<16x8xbf16>, vector<8x64xbf16>, vector<16x64xf32> -> vector<16x64xf32>
    %c0_45 = arith.constant 0 : index
    %c0_46 = arith.constant 0 : index
    %c0_47 = arith.constant 0 : index
    %82 = vector.load %arg15[%c0_45, %c0_46, %c0_47] : memref<2x32x64xbf16, #tpu.memory_space<vmem>>, vector<1x32x64xbf16>
    %83 = vector.shape_cast %82 : vector<1x32x64xbf16> to vector<32x64xbf16>
    %84 = arith.truncf %68 : vector<16x32xf32> to vector<16x32xbf16>
    %cst_48 = arith.constant dense<0.000000e+00> : vector<16x64xf32>
    %85 = tpu.matmul %84, %83, %cst_48 {dimension_numbers = #tpu.dot_dimension_numbers<[1], [0], [0], [1], [0, 0, 1, 1], [], []>} : vector<16x32xbf16>, vector<32x64xbf16>, vector<16x64xf32> -> vector<16x64xf32>
    %86 = arith.addf %81, %85 : vector<16x64xf32>
    %c0_49 = arith.constant 0 : index
    %c0_50 = arith.constant 0 : index
    %c0_51 = arith.constant 0 : index
    %87 = vector.load %arg16[%c0_49, %c0_50, %c0_51] : memref<2x16x64xbf16, #tpu.memory_space<vmem>>, vector<1x16x64xbf16>
    %88 = vector.shape_cast %87 : vector<1x16x64xbf16> to vector<16x64xbf16>
    %89 = arith.truncf %73 : vector<16x16xf32> to vector<16x16xbf16>
    %cst_52 = arith.constant dense<0.000000e+00> : vector<16x64xf32>
    %90 = tpu.matmul %89, %88, %cst_52 {dimension_numbers = #tpu.dot_dimension_numbers<[1], [0], [0], [1], [0, 0, 1, 1], [], []>} : vector<16x16xbf16>, vector<16x64xbf16>, vector<16x64xf32> -> vector<16x64xf32>
    %91 = arith.addf %86, %90 : vector<16x64xf32>
    %c0_53 = arith.constant 0 : index
    %c0_54 = arith.constant 0 : index
    %c0_55 = arith.constant 0 : index
    %92 = vector.load %arg17[%c0_53, %c0_54, %c0_55] : memref<2x1x64xf32, #tpu.memory_space<vmem>>, vector<1x1x64xf32>
    %93 = vector.shape_cast %92 : vector<1x1x64xf32> to vector<1x64xf32>
    %94 = vector.broadcast %93 : vector<1x64xf32> to vector<16x64xf32>
    %95 = arith.addf %91, %94 : vector<16x64xf32>
    %96 = vector.extract_strided_slice %95 {offsets = [0, 0], sizes = [16, 48], strides = [1, 1]} : vector<16x64xf32> to vector<16x48xf32>
    %97 = arith.negf %96 : vector<16x48xf32>
    %98 = math.exp %97 : vector<16x48xf32>
    %cst_56 = arith.constant 1.000000e+00 : f32
    %99 = vector.broadcast %cst_56 : f32 to vector<16x48xf32>
    %100 = arith.addf %99, %98 : vector<16x48xf32>
    %101 = arith.divf %99, %100 : vector<16x48xf32>
    %102 = vector.extract_strided_slice %95 {offsets = [0, 48], sizes = [16, 16], strides = [1, 1]} : vector<16x64xf32> to vector<16x16xf32>
    %103 = math.tanh %102 : vector<16x16xf32>
    %104 = vector.extract_strided_slice %101 {offsets = [0, 0], sizes = [16, 16], strides = [1, 1]} : vector<16x48xf32> to vector<16x16xf32>
    %105 = vector.extract_strided_slice %101 {offsets = [0, 16], sizes = [16, 16], strides = [1, 1]} : vector<16x48xf32> to vector<16x16xf32>
    %106 = vector.extract_strided_slice %101 {offsets = [0, 32], sizes = [16, 16], strides = [1, 1]} : vector<16x48xf32> to vector<16x16xf32>
    %107 = arith.mulf %105, %75 : vector<16x16xf32>
    %108 = arith.mulf %104, %103 : vector<16x16xf32>
    %109 = arith.addf %107, %108 : vector<16x16xf32>
    %110 = math.tanh %109 : vector<16x16xf32>
    %111 = arith.mulf %106, %110 : vector<16x16xf32>
    %c0_57 = arith.constant 0 : index
    %c0_58 = arith.constant 0 : index
    %c0_59 = arith.constant 0 : index
    %112 = vector.load %arg18[%c0_57, %c0_58, %c0_59] : memref<2x16x16xbf16, #tpu.memory_space<vmem>>, vector<1x16x16xbf16>
    %113 = vector.shape_cast %112 : vector<1x16x16xbf16> to vector<16x16xbf16>
    %114 = arith.truncf %111 : vector<16x16xf32> to vector<16x16xbf16>
    %cst_60 = arith.constant dense<0.000000e+00> : vector<16x16xf32>
    %115 = tpu.matmul %114, %113, %cst_60 {dimension_numbers = #tpu.dot_dimension_numbers<[1], [0], [0], [1], [0, 0, 1, 1], [], []>} : vector<16x16xbf16>, vector<16x16xbf16>, vector<16x16xf32> -> vector<16x16xf32>
    %c0_61 = arith.constant 0 : index
    %c0_62 = arith.constant 0 : index
    %c0_63 = arith.constant 0 : index
    %116 = vector.load %arg19[%c0_61, %c0_62, %c0_63] : memref<2x1x16xf32, #tpu.memory_space<vmem>>, vector<1x1x16xf32>
    %117 = vector.shape_cast %116 : vector<1x1x16xf32> to vector<1x16xf32>
    %118 = vector.broadcast %117 : vector<1x16xf32> to vector<16x16xf32>
    %119 = arith.addf %115, %118 : vector<16x16xf32>
    %120 = vector.extract_strided_slice %119 {offsets = [0, 0], sizes = [16, 8], strides = [1, 1]} : vector<16x16xf32> to vector<16x8xf32>
    %121 = vector.extract_strided_slice %119 {offsets = [0, 8], sizes = [16, 8], strides = [1, 1]} : vector<16x16xf32> to vector<16x8xf32>
    %c0_64 = arith.constant 0 : index
    %c0_65 = arith.constant 0 : index
    %c0_66 = arith.constant 0 : index
    %122 = vector.load %arg20[%c0_64, %c0_65, %c0_66] : memref<2x16x16xbf16, #tpu.memory_space<vmem>>, vector<1x16x16xbf16>
    %123 = vector.shape_cast %122 : vector<1x16x16xbf16> to vector<16x16xbf16>
    %124 = arith.truncf %73 : vector<16x16xf32> to vector<16x16xbf16>
    %cst_67 = arith.constant dense<0.000000e+00> : vector<16x16xf32>
    %125 = tpu.matmul %124, %123, %cst_67 {dimension_numbers = #tpu.dot_dimension_numbers<[1], [0], [0], [1], [0, 0, 1, 1], [], []>} : vector<16x16xbf16>, vector<16x16xbf16>, vector<16x16xf32> -> vector<16x16xf32>
    %c0_68 = arith.constant 0 : index
    %c0_69 = arith.constant 0 : index
    %c0_70 = arith.constant 0 : index
    %126 = vector.load %arg21[%c0_68, %c0_69, %c0_70] : memref<2x1x16xf32, #tpu.memory_space<vmem>>, vector<1x1x16xf32>
    %127 = vector.shape_cast %126 : vector<1x1x16xf32> to vector<1x16xf32>
    %128 = vector.broadcast %127 : vector<1x16xf32> to vector<16x16xf32>
    %129 = arith.addf %125, %128 : vector<16x16xf32>
    %130 = vector.extract_strided_slice %129 {offsets = [0, 0], sizes = [16, 8], strides = [1, 1]} : vector<16x16xf32> to vector<16x8xf32>
    %131 = vector.extract_strided_slice %129 {offsets = [0, 8], sizes = [16, 8], strides = [1, 1]} : vector<16x16xf32> to vector<16x8xf32>
    %cst_71 = arith.constant 5.000000e-01 : f32
    %132 = vector.broadcast %cst_71 : f32 to vector<16x8xf32>
    %133 = arith.mulf %132, %121 : vector<16x8xf32>
    %134 = math.exp %133 : vector<16x8xf32>
    %c0_72 = arith.constant 0 : index
    %c0_73 = arith.constant 0 : index
    %c0_74 = arith.constant 0 : index
    %135 = vector.load %arg13[%c0_72, %c0_73, %c0_74] : memref<2x16x8xf32, #tpu.memory_space<vmem>>, vector<1x16x8xf32>
    %136 = vector.shape_cast %135 : vector<1x16x8xf32> to vector<16x8xf32>
    %137 = arith.mulf %134, %136 : vector<16x8xf32>
    %138 = arith.addf %120, %137 : vector<16x8xf32>
    %c0_75 = arith.constant 0 : index
    %c0_76 = arith.constant 0 : index
    %c0_77 = arith.constant 0 : index
    %139 = vector.load %arg22[%c0_75, %c0_76, %c0_77] : memref<2x8x64xbf16, #tpu.memory_space<vmem>>, vector<1x8x64xbf16>
    %140 = vector.shape_cast %139 : vector<1x8x64xbf16> to vector<8x64xbf16>
    %141 = arith.truncf %138 : vector<16x8xf32> to vector<16x8xbf16>
    %cst_78 = arith.constant dense<0.000000e+00> : vector<16x64xf32>
    %142 = tpu.matmul %141, %140, %cst_78 {dimension_numbers = #tpu.dot_dimension_numbers<[1], [0], [0], [1], [0, 0, 1, 1], [], []>} : vector<16x8xbf16>, vector<8x64xbf16>, vector<16x64xf32> -> vector<16x64xf32>
    %c0_79 = arith.constant 0 : index
    %c0_80 = arith.constant 0 : index
    %c0_81 = arith.constant 0 : index
    %143 = vector.load %arg23[%c0_79, %c0_80, %c0_81] : memref<2x32x64xbf16, #tpu.memory_space<vmem>>, vector<1x32x64xbf16>
    %144 = vector.shape_cast %143 : vector<1x32x64xbf16> to vector<32x64xbf16>
    %145 = arith.truncf %68 : vector<16x32xf32> to vector<16x32xbf16>
    %cst_82 = arith.constant dense<0.000000e+00> : vector<16x64xf32>
    %146 = tpu.matmul %145, %144, %cst_82 {dimension_numbers = #tpu.dot_dimension_numbers<[1], [0], [0], [1], [0, 0, 1, 1], [], []>} : vector<16x32xbf16>, vector<32x64xbf16>, vector<16x64xf32> -> vector<16x64xf32>
    %147 = arith.addf %142, %146 : vector<16x64xf32>
    %c0_83 = arith.constant 0 : index
    %c0_84 = arith.constant 0 : index
    %c0_85 = arith.constant 0 : index
    %148 = vector.load %arg24[%c0_83, %c0_84, %c0_85] : memref<2x1x64xf32, #tpu.memory_space<vmem>>, vector<1x1x64xf32>
    %149 = vector.shape_cast %148 : vector<1x1x64xf32> to vector<1x64xf32>
    %150 = vector.broadcast %149 : vector<1x64xf32> to vector<16x64xf32>
    %151 = arith.addf %147, %150 : vector<16x64xf32>
    %152 = vector.extract_strided_slice %151 {offsets = [0, 0], sizes = [16, 48], strides = [1, 1]} : vector<16x64xf32> to vector<16x48xf32>
    %153 = arith.negf %152 : vector<16x48xf32>
    %154 = math.exp %153 : vector<16x48xf32>
    %cst_86 = arith.constant 1.000000e+00 : f32
    %155 = vector.broadcast %cst_86 : f32 to vector<16x48xf32>
    %156 = arith.addf %155, %154 : vector<16x48xf32>
    %157 = arith.divf %155, %156 : vector<16x48xf32>
    %158 = vector.extract_strided_slice %151 {offsets = [0, 48], sizes = [16, 16], strides = [1, 1]} : vector<16x64xf32> to vector<16x16xf32>
    %159 = math.tanh %158 : vector<16x16xf32>
    %160 = vector.extract_strided_slice %157 {offsets = [0, 0], sizes = [16, 16], strides = [1, 1]} : vector<16x48xf32> to vector<16x16xf32>
    %161 = vector.extract_strided_slice %157 {offsets = [0, 16], sizes = [16, 16], strides = [1, 1]} : vector<16x48xf32> to vector<16x16xf32>
    %162 = vector.extract_strided_slice %157 {offsets = [0, 32], sizes = [16, 16], strides = [1, 1]} : vector<16x48xf32> to vector<16x16xf32>
    %163 = arith.mulf %161, %74 : vector<16x16xf32>
    %164 = arith.mulf %160, %159 : vector<16x16xf32>
    %165 = arith.addf %163, %164 : vector<16x16xf32>
    %166 = math.tanh %165 : vector<16x16xf32>
    %167 = arith.mulf %162, %166 : vector<16x16xf32>
    %c0_87 = arith.constant 0 : index
    %c0_88 = arith.constant 0 : index
    %c0_89 = arith.constant 0 : index
    %168 = vector.load %arg25[%c0_87, %c0_88, %c0_89] : memref<2x16x16xbf16, #tpu.memory_space<vmem>>, vector<1x16x16xbf16>
    %169 = vector.shape_cast %168 : vector<1x16x16xbf16> to vector<16x16xbf16>
    %170 = arith.truncf %167 : vector<16x16xf32> to vector<16x16xbf16>
    %cst_90 = arith.constant dense<0.000000e+00> : vector<16x16xf32>
    %171 = tpu.matmul %170, %169, %cst_90 {dimension_numbers = #tpu.dot_dimension_numbers<[1], [0], [0], [1], [0, 0, 1, 1], [], []>} : vector<16x16xbf16>, vector<16x16xbf16>, vector<16x16xf32> -> vector<16x16xf32>
    %172 = arith.addf %76, %171 : vector<16x16xf32>
    %c0_91 = arith.constant 0 : index
    %c0_92 = arith.constant 0 : index
    %c0_93 = arith.constant 0 : index
    %173 = vector.load %arg26[%c0_91, %c0_92, %c0_93] : memref<2x1x16xf32, #tpu.memory_space<vmem>>, vector<1x1x16xf32>
    %174 = vector.shape_cast %173 : vector<1x1x16xf32> to vector<1x16xf32>
    %175 = vector.broadcast %174 : vector<1x16xf32> to vector<16x16xf32>
    %176 = arith.addf %172, %175 : vector<16x16xf32>
    %177 = arith.subf %131, %121 : vector<16x8xf32>
    %178 = math.exp %121 : vector<16x8xf32>
    %179 = arith.subf %120, %130 : vector<16x8xf32>
    %180 = arith.mulf %179, %179 : vector<16x8xf32>
    %181 = arith.addf %178, %180 : vector<16x8xf32>
    %cst_94 = arith.constant 0.000000e+00 : f32
    %182 = vector.broadcast %cst_94 : f32 to vector<16x8xf32>
    %183 = arith.subf %182, %131 : vector<16x8xf32>
    %184 = math.exp %183 : vector<16x8xf32>
    %185 = arith.mulf %181, %184 : vector<16x8xf32>
    %186 = arith.addf %177, %185 : vector<16x8xf32>
    %cst_95 = arith.constant 1.000000e+00 : f32
    %187 = vector.broadcast %cst_95 : f32 to vector<16x8xf32>
    %188 = arith.subf %186, %187 : vector<16x8xf32>
    %cst_96 = arith.constant 5.000000e-01 : f32
    %189 = vector.broadcast %cst_96 : f32 to vector<16x8xf32>
    %190 = arith.mulf %189, %188 : vector<16x8xf32>
    %191 = arith.addf %77, %190 : vector<16x8xf32>
    %c1 = arith.constant 1 : index
    %c0_97 = arith.constant 0 : index
    %c0_98 = arith.constant 0 : index
    %192 = vector.load %arg14[%c1, %c0_97, %c0_98] : memref<2x8x64xbf16, #tpu.memory_space<vmem>>, vector<1x8x64xbf16>
    %193 = vector.shape_cast %192 : vector<1x8x64xbf16> to vector<8x64xbf16>
    %194 = arith.truncf %72 : vector<16x8xf32> to vector<16x8xbf16>
    %cst_99 = arith.constant dense<0.000000e+00> : vector<16x64xf32>
    %195 = tpu.matmul %194, %193, %cst_99 {dimension_numbers = #tpu.dot_dimension_numbers<[1], [0], [0], [1], [0, 0, 1, 1], [], []>} : vector<16x8xbf16>, vector<8x64xbf16>, vector<16x64xf32> -> vector<16x64xf32>
    %c1_100 = arith.constant 1 : index
    %c0_101 = arith.constant 0 : index
    %c0_102 = arith.constant 0 : index
    %196 = vector.load %arg15[%c1_100, %c0_101, %c0_102] : memref<2x32x64xbf16, #tpu.memory_space<vmem>>, vector<1x32x64xbf16>
    %197 = vector.shape_cast %196 : vector<1x32x64xbf16> to vector<32x64xbf16>
    %198 = arith.truncf %68 : vector<16x32xf32> to vector<16x32xbf16>
    %cst_103 = arith.constant dense<0.000000e+00> : vector<16x64xf32>
    %199 = tpu.matmul %198, %197, %cst_103 {dimension_numbers = #tpu.dot_dimension_numbers<[1], [0], [0], [1], [0, 0, 1, 1], [], []>} : vector<16x32xbf16>, vector<32x64xbf16>, vector<16x64xf32> -> vector<16x64xf32>
    %200 = arith.addf %195, %199 : vector<16x64xf32>
    %c1_104 = arith.constant 1 : index
    %c0_105 = arith.constant 0 : index
    %c0_106 = arith.constant 0 : index
    %201 = vector.load %arg16[%c1_104, %c0_105, %c0_106] : memref<2x16x64xbf16, #tpu.memory_space<vmem>>, vector<1x16x64xbf16>
    %202 = vector.shape_cast %201 : vector<1x16x64xbf16> to vector<16x64xbf16>
    %203 = arith.truncf %167 : vector<16x16xf32> to vector<16x16xbf16>
    %cst_107 = arith.constant dense<0.000000e+00> : vector<16x64xf32>
    %204 = tpu.matmul %203, %202, %cst_107 {dimension_numbers = #tpu.dot_dimension_numbers<[1], [0], [0], [1], [0, 0, 1, 1], [], []>} : vector<16x16xbf16>, vector<16x64xbf16>, vector<16x64xf32> -> vector<16x64xf32>
    %205 = arith.addf %200, %204 : vector<16x64xf32>
    %c1_108 = arith.constant 1 : index
    %c0_109 = arith.constant 0 : index
    %c0_110 = arith.constant 0 : index
    %206 = vector.load %arg17[%c1_108, %c0_109, %c0_110] : memref<2x1x64xf32, #tpu.memory_space<vmem>>, vector<1x1x64xf32>
    %207 = vector.shape_cast %206 : vector<1x1x64xf32> to vector<1x64xf32>
    %208 = vector.broadcast %207 : vector<1x64xf32> to vector<16x64xf32>
    %209 = arith.addf %205, %208 : vector<16x64xf32>
    %210 = vector.extract_strided_slice %209 {offsets = [0, 0], sizes = [16, 48], strides = [1, 1]} : vector<16x64xf32> to vector<16x48xf32>
    %211 = arith.negf %210 : vector<16x48xf32>
    %212 = math.exp %211 : vector<16x48xf32>
    %cst_111 = arith.constant 1.000000e+00 : f32
    %213 = vector.broadcast %cst_111 : f32 to vector<16x48xf32>
    %214 = arith.addf %213, %212 : vector<16x48xf32>
    %215 = arith.divf %213, %214 : vector<16x48xf32>
    %216 = vector.extract_strided_slice %209 {offsets = [0, 48], sizes = [16, 16], strides = [1, 1]} : vector<16x64xf32> to vector<16x16xf32>
    %217 = math.tanh %216 : vector<16x16xf32>
    %218 = vector.extract_strided_slice %215 {offsets = [0, 0], sizes = [16, 16], strides = [1, 1]} : vector<16x48xf32> to vector<16x16xf32>
    %219 = vector.extract_strided_slice %215 {offsets = [0, 16], sizes = [16, 16], strides = [1, 1]} : vector<16x48xf32> to vector<16x16xf32>
    %220 = vector.extract_strided_slice %215 {offsets = [0, 32], sizes = [16, 16], strides = [1, 1]} : vector<16x48xf32> to vector<16x16xf32>
    %221 = arith.mulf %219, %109 : vector<16x16xf32>
    %222 = arith.mulf %218, %217 : vector<16x16xf32>
    %223 = arith.addf %221, %222 : vector<16x16xf32>
    %224 = math.tanh %223 : vector<16x16xf32>
    %225 = arith.mulf %220, %224 : vector<16x16xf32>
    %c1_112 = arith.constant 1 : index
    %c0_113 = arith.constant 0 : index
    %c0_114 = arith.constant 0 : index
    %226 = vector.load %arg18[%c1_112, %c0_113, %c0_114] : memref<2x16x16xbf16, #tpu.memory_space<vmem>>, vector<1x16x16xbf16>
    %227 = vector.shape_cast %226 : vector<1x16x16xbf16> to vector<16x16xbf16>
    %228 = arith.truncf %225 : vector<16x16xf32> to vector<16x16xbf16>
    %cst_115 = arith.constant dense<0.000000e+00> : vector<16x16xf32>
    %229 = tpu.matmul %228, %227, %cst_115 {dimension_numbers = #tpu.dot_dimension_numbers<[1], [0], [0], [1], [0, 0, 1, 1], [], []>} : vector<16x16xbf16>, vector<16x16xbf16>, vector<16x16xf32> -> vector<16x16xf32>
    %c1_116 = arith.constant 1 : index
    %c0_117 = arith.constant 0 : index
    %c0_118 = arith.constant 0 : index
    %230 = vector.load %arg19[%c1_116, %c0_117, %c0_118] : memref<2x1x16xf32, #tpu.memory_space<vmem>>, vector<1x1x16xf32>
    %231 = vector.shape_cast %230 : vector<1x1x16xf32> to vector<1x16xf32>
    %232 = vector.broadcast %231 : vector<1x16xf32> to vector<16x16xf32>
    %233 = arith.addf %229, %232 : vector<16x16xf32>
    %234 = vector.extract_strided_slice %233 {offsets = [0, 0], sizes = [16, 8], strides = [1, 1]} : vector<16x16xf32> to vector<16x8xf32>
    %235 = vector.extract_strided_slice %233 {offsets = [0, 8], sizes = [16, 8], strides = [1, 1]} : vector<16x16xf32> to vector<16x8xf32>
    %c1_119 = arith.constant 1 : index
    %c0_120 = arith.constant 0 : index
    %c0_121 = arith.constant 0 : index
    %236 = vector.load %arg20[%c1_119, %c0_120, %c0_121] : memref<2x16x16xbf16, #tpu.memory_space<vmem>>, vector<1x16x16xbf16>
    %237 = vector.shape_cast %236 : vector<1x16x16xbf16> to vector<16x16xbf16>
    %238 = arith.truncf %167 : vector<16x16xf32> to vector<16x16xbf16>
    %cst_122 = arith.constant dense<0.000000e+00> : vector<16x16xf32>
    %239 = tpu.matmul %238, %237, %cst_122 {dimension_numbers = #tpu.dot_dimension_numbers<[1], [0], [0], [1], [0, 0, 1, 1], [], []>} : vector<16x16xbf16>, vector<16x16xbf16>, vector<16x16xf32> -> vector<16x16xf32>
    %c1_123 = arith.constant 1 : index
    %c0_124 = arith.constant 0 : index
    %c0_125 = arith.constant 0 : index
    %240 = vector.load %arg21[%c1_123, %c0_124, %c0_125] : memref<2x1x16xf32, #tpu.memory_space<vmem>>, vector<1x1x16xf32>
    %241 = vector.shape_cast %240 : vector<1x1x16xf32> to vector<1x16xf32>
    %242 = vector.broadcast %241 : vector<1x16xf32> to vector<16x16xf32>
    %243 = arith.addf %239, %242 : vector<16x16xf32>
    %244 = vector.extract_strided_slice %243 {offsets = [0, 0], sizes = [16, 8], strides = [1, 1]} : vector<16x16xf32> to vector<16x8xf32>
    %245 = vector.extract_strided_slice %243 {offsets = [0, 8], sizes = [16, 8], strides = [1, 1]} : vector<16x16xf32> to vector<16x8xf32>
    %cst_126 = arith.constant 5.000000e-01 : f32
    %246 = vector.broadcast %cst_126 : f32 to vector<16x8xf32>
    %247 = arith.mulf %246, %235 : vector<16x8xf32>
    %248 = math.exp %247 : vector<16x8xf32>
    %c1_127 = arith.constant 1 : index
    %c0_128 = arith.constant 0 : index
    %c0_129 = arith.constant 0 : index
    %249 = vector.load %arg13[%c1_127, %c0_128, %c0_129] : memref<2x16x8xf32, #tpu.memory_space<vmem>>, vector<1x16x8xf32>
    %250 = vector.shape_cast %249 : vector<1x16x8xf32> to vector<16x8xf32>
    %251 = arith.mulf %248, %250 : vector<16x8xf32>
    %252 = arith.addf %234, %251 : vector<16x8xf32>
    %c1_130 = arith.constant 1 : index
    %c0_131 = arith.constant 0 : index
    %c0_132 = arith.constant 0 : index
    %253 = vector.load %arg22[%c1_130, %c0_131, %c0_132] : memref<2x8x64xbf16, #tpu.memory_space<vmem>>, vector<1x8x64xbf16>
    %254 = vector.shape_cast %253 : vector<1x8x64xbf16> to vector<8x64xbf16>
    %255 = arith.truncf %252 : vector<16x8xf32> to vector<16x8xbf16>
    %cst_133 = arith.constant dense<0.000000e+00> : vector<16x64xf32>
    %256 = tpu.matmul %255, %254, %cst_133 {dimension_numbers = #tpu.dot_dimension_numbers<[1], [0], [0], [1], [0, 0, 1, 1], [], []>} : vector<16x8xbf16>, vector<8x64xbf16>, vector<16x64xf32> -> vector<16x64xf32>
    %c1_134 = arith.constant 1 : index
    %c0_135 = arith.constant 0 : index
    %c0_136 = arith.constant 0 : index
    %257 = vector.load %arg23[%c1_134, %c0_135, %c0_136] : memref<2x32x64xbf16, #tpu.memory_space<vmem>>, vector<1x32x64xbf16>
    %258 = vector.shape_cast %257 : vector<1x32x64xbf16> to vector<32x64xbf16>
    %259 = arith.truncf %68 : vector<16x32xf32> to vector<16x32xbf16>
    %cst_137 = arith.constant dense<0.000000e+00> : vector<16x64xf32>
    %260 = tpu.matmul %259, %258, %cst_137 {dimension_numbers = #tpu.dot_dimension_numbers<[1], [0], [0], [1], [0, 0, 1, 1], [], []>} : vector<16x32xbf16>, vector<32x64xbf16>, vector<16x64xf32> -> vector<16x64xf32>
    %261 = arith.addf %256, %260 : vector<16x64xf32>
    %c1_138 = arith.constant 1 : index
    %c0_139 = arith.constant 0 : index
    %c0_140 = arith.constant 0 : index
    %262 = vector.load %arg24[%c1_138, %c0_139, %c0_140] : memref<2x1x64xf32, #tpu.memory_space<vmem>>, vector<1x1x64xf32>
    %263 = vector.shape_cast %262 : vector<1x1x64xf32> to vector<1x64xf32>
    %264 = vector.broadcast %263 : vector<1x64xf32> to vector<16x64xf32>
    %265 = arith.addf %261, %264 : vector<16x64xf32>
    %266 = vector.extract_strided_slice %265 {offsets = [0, 0], sizes = [16, 48], strides = [1, 1]} : vector<16x64xf32> to vector<16x48xf32>
    %267 = arith.negf %266 : vector<16x48xf32>
    %268 = math.exp %267 : vector<16x48xf32>
    %cst_141 = arith.constant 1.000000e+00 : f32
    %269 = vector.broadcast %cst_141 : f32 to vector<16x48xf32>
    %270 = arith.addf %269, %268 : vector<16x48xf32>
    %271 = arith.divf %269, %270 : vector<16x48xf32>
    %272 = vector.extract_strided_slice %265 {offsets = [0, 48], sizes = [16, 16], strides = [1, 1]} : vector<16x64xf32> to vector<16x16xf32>
    %273 = math.tanh %272 : vector<16x16xf32>
    %274 = vector.extract_strided_slice %271 {offsets = [0, 0], sizes = [16, 16], strides = [1, 1]} : vector<16x48xf32> to vector<16x16xf32>
    %275 = vector.extract_strided_slice %271 {offsets = [0, 16], sizes = [16, 16], strides = [1, 1]} : vector<16x48xf32> to vector<16x16xf32>
    %276 = vector.extract_strided_slice %271 {offsets = [0, 32], sizes = [16, 16], strides = [1, 1]} : vector<16x48xf32> to vector<16x16xf32>
    %277 = arith.mulf %275, %165 : vector<16x16xf32>
    %278 = arith.mulf %274, %273 : vector<16x16xf32>
    %279 = arith.addf %277, %278 : vector<16x16xf32>
    %280 = math.tanh %279 : vector<16x16xf32>
    %281 = arith.mulf %276, %280 : vector<16x16xf32>
    %c1_142 = arith.constant 1 : index
    %c0_143 = arith.constant 0 : index
    %c0_144 = arith.constant 0 : index
    %282 = vector.load %arg25[%c1_142, %c0_143, %c0_144] : memref<2x16x16xbf16, #tpu.memory_space<vmem>>, vector<1x16x16xbf16>
    %283 = vector.shape_cast %282 : vector<1x16x16xbf16> to vector<16x16xbf16>
    %284 = arith.truncf %281 : vector<16x16xf32> to vector<16x16xbf16>
    %cst_145 = arith.constant dense<0.000000e+00> : vector<16x16xf32>
    %285 = tpu.matmul %284, %283, %cst_145 {dimension_numbers = #tpu.dot_dimension_numbers<[1], [0], [0], [1], [0, 0, 1, 1], [], []>} : vector<16x16xbf16>, vector<16x16xbf16>, vector<16x16xf32> -> vector<16x16xf32>
    %286 = arith.addf %176, %285 : vector<16x16xf32>
    %c1_146 = arith.constant 1 : index
    %c0_147 = arith.constant 0 : index
    %c0_148 = arith.constant 0 : index
    %287 = vector.load %arg26[%c1_146, %c0_147, %c0_148] : memref<2x1x16xf32, #tpu.memory_space<vmem>>, vector<1x1x16xf32>
    %288 = vector.shape_cast %287 : vector<1x1x16xf32> to vector<1x16xf32>
    %289 = vector.broadcast %288 : vector<1x16xf32> to vector<16x16xf32>
    %290 = arith.addf %286, %289 : vector<16x16xf32>
    %291 = arith.subf %245, %235 : vector<16x8xf32>
    %292 = math.exp %235 : vector<16x8xf32>
    %293 = arith.subf %234, %244 : vector<16x8xf32>
    %294 = arith.mulf %293, %293 : vector<16x8xf32>
    %295 = arith.addf %292, %294 : vector<16x8xf32>
    %cst_149 = arith.constant 0.000000e+00 : f32
    %296 = vector.broadcast %cst_149 : f32 to vector<16x8xf32>
    %297 = arith.subf %296, %245 : vector<16x8xf32>
    %298 = math.exp %297 : vector<16x8xf32>
    %299 = arith.mulf %295, %298 : vector<16x8xf32>
    %300 = arith.addf %291, %299 : vector<16x8xf32>
    %cst_150 = arith.constant 1.000000e+00 : f32
    %301 = vector.broadcast %cst_150 : f32 to vector<16x8xf32>
    %302 = arith.subf %300, %301 : vector<16x8xf32>
    %cst_151 = arith.constant 5.000000e-01 : f32
    %303 = vector.broadcast %cst_151 : f32 to vector<16x8xf32>
    %304 = arith.mulf %303, %302 : vector<16x8xf32>
    %305 = arith.addf %191, %304 : vector<16x8xf32>
    %c0_152 = arith.constant 0 : index
    %c0_153 = arith.constant 0 : index
    %306 = vector.load %arg27[%c0_152, %c0_153] : memref<16x48xbf16, #tpu.memory_space<vmem>>, vector<16x48xbf16>
    %307 = arith.truncf %290 : vector<16x16xf32> to vector<16x16xbf16>
    %cst_154 = arith.constant dense<0.000000e+00> : vector<16x48xf32>
    %308 = tpu.matmul %307, %306, %cst_154 {dimension_numbers = #tpu.dot_dimension_numbers<[1], [0], [0], [1], [0, 0, 1, 1], [], []>} : vector<16x16xbf16>, vector<16x48xbf16>, vector<16x48xf32> -> vector<16x48xf32>
    %c0_155 = arith.constant 0 : index
    %c0_156 = arith.constant 0 : index
    %309 = vector.load %arg28[%c0_155, %c0_156] : memref<1x48xf32, #tpu.memory_space<vmem>>, vector<1x48xf32>
    %310 = vector.broadcast %309 : vector<1x48xf32> to vector<16x48xf32>
    %311 = arith.addf %308, %310 : vector<16x48xf32>
    %312 = arith.negf %311 : vector<16x48xf32>
    %313 = math.exp %312 : vector<16x48xf32>
    %cst_157 = arith.constant 1.000000e+00 : f32
    %314 = vector.broadcast %cst_157 : f32 to vector<16x48xf32>
    %315 = arith.addf %314, %313 : vector<16x48xf32>
    %316 = arith.divf %314, %315 : vector<16x48xf32>
    %c0_158 = arith.constant 0 : index
    %c0_159 = arith.constant 0 : index
    %317 = vector.load %arg29[%c0_158, %c0_159] : memref<16x48xf32, #tpu.memory_space<vmem>>, vector<16x48xf32>
    tpu.vector_store %arg29[%c0_158, %c0_159], %316 {strides = array<i32>} : memref<16x48xf32, #tpu.memory_space<vmem>>, vector<16x48xf32>,
    %c0_160 = arith.constant 0 : index
    %c0_161 = arith.constant 0 : index
    %318 = vector.load %arg30[%c0_160, %c0_161] : memref<16x8xf32, #tpu.memory_space<vmem>>, vector<16x8xf32>
    tpu.vector_store %arg30[%c0_160, %c0_161], %305 {strides = array<i32>} : memref<16x8xf32, #tpu.memory_space<vmem>>, vector<16x8xf32>,
    return
  }
  func.func @transform_0(%arg0: i32) -> (i32, i32) {
    %c0_i32 = arith.constant 0 : i32
    %c0_i32_0 = arith.constant 0 : i32
    return %arg0, %c0_i32 : i32, i32
  }
  func.func @transform_1(%arg0: i32) -> (i32, i32) {
    %c0_i32 = arith.constant 0 : i32
    %c0_i32_0 = arith.constant 0 : i32
    return %arg0, %c0_i32 : i32, i32
  }
  func.func @transform_2(%arg0: i32) -> (i32, i32) {
    %c0_i32 = arith.constant 0 : i32
    %c0_i32_0 = arith.constant 0 : i32
    %c0_i32_1 = arith.constant 0 : i32
    return %c0_i32, %c0_i32_0 : i32, i32
  }
  func.func @transform_3(%arg0: i32) -> (i32, i32) {
    %c0_i32 = arith.constant 0 : i32
    %c0_i32_0 = arith.constant 0 : i32
    %c0_i32_1 = arith.constant 0 : i32
    return %c0_i32, %c0_i32_0 : i32, i32
  }
  func.func @transform_4(%arg0: i32) -> (i32, i32) {
    %c0_i32 = arith.constant 0 : i32
    %c0_i32_0 = arith.constant 0 : i32
    %c0_i32_1 = arith.constant 0 : i32
    return %c0_i32, %c0_i32_0 : i32, i32
  }
  func.func @transform_5(%arg0: i32) -> (i32, i32, i32) {
    %c0_i32 = arith.constant 0 : i32
    %c0_i32_0 = arith.constant 0 : i32
    %c0_i32_1 = arith.constant 0 : i32
    return %arg0, %c0_i32, %c0_i32_0 : i32, i32, i32
  }
  func.func @transform_6(%arg0: i32) -> (i32, i32) {
    %c0_i32 = arith.constant 0 : i32
    %c0_i32_0 = arith.constant 0 : i32
    %c0_i32_1 = arith.constant 0 : i32
    return %c0_i32, %c0_i32_0 : i32, i32
  }
  func.func @transform_7(%arg0: i32) -> (i32, i32) {
    %c0_i32 = arith.constant 0 : i32
    %c0_i32_0 = arith.constant 0 : i32
    %c0_i32_1 = arith.constant 0 : i32
    return %c0_i32, %c0_i32_0 : i32, i32
  }
  func.func @transform_8(%arg0: i32) -> (i32, i32) {
    %c0_i32 = arith.constant 0 : i32
    %c0_i32_0 = arith.constant 0 : i32
    %c0_i32_1 = arith.constant 0 : i32
    return %c0_i32, %c0_i32_0 : i32, i32
  }
  func.func @transform_9(%arg0: i32) -> (i32, i32) {
    %c0_i32 = arith.constant 0 : i32
    %c0_i32_0 = arith.constant 0 : i32
    %c0_i32_1 = arith.constant 0 : i32
    return %c0_i32, %c0_i32_0 : i32, i32
  }
  func.func @transform_10(%arg0: i32) -> (i32, i32) {
    %c0_i32 = arith.constant 0 : i32
    %c0_i32_0 = arith.constant 0 : i32
    %c0_i32_1 = arith.constant 0 : i32
    return %c0_i32, %c0_i32_0 : i32, i32
  }
  func.func @transform_11(%arg0: i32) -> (i32, i32) {
    %c0_i32 = arith.constant 0 : i32
    %c0_i32_0 = arith.constant 0 : i32
    %c0_i32_1 = arith.constant 0 : i32
    return %c0_i32, %c0_i32_0 : i32, i32
  }
  func.func @transform_12(%arg0: i32) -> (i32, i32, i32) {
    %c0_i32 = arith.constant 0 : i32
    %c0_i32_0 = arith.constant 0 : i32
    %c0_i32_1 = arith.constant 0 : i32
    return %c0_i32, %arg0, %c0_i32_0 : i32, i32, i32
  }
  func.func @transform_13(%arg0: i32) -> (i32, i32, i32) {
    %c0_i32 = arith.constant 0 : i32
    %c0_i32_0 = arith.constant 0 : i32
    %c0_i32_1 = arith.constant 0 : i32
    %c0_i32_2 = arith.constant 0 : i32
    return %c0_i32, %c0_i32_0, %c0_i32_1 : i32, i32, i32
  }
  func.func @transform_14(%arg0: i32) -> (i32, i32, i32) {
    %c0_i32 = arith.constant 0 : i32
    %c0_i32_0 = arith.constant 0 : i32
    %c0_i32_1 = arith.constant 0 : i32
    %c0_i32_2 = arith.constant 0 : i32
    return %c0_i32, %c0_i32_0, %c0_i32_1 : i32, i32, i32
  }
  func.func @transform_15(%arg0: i32) -> (i32, i32, i32) {
    %c0_i32 = arith.constant 0 : i32
    %c0_i32_0 = arith.constant 0 : i32
    %c0_i32_1 = arith.constant 0 : i32
    %c0_i32_2 = arith.constant 0 : i32
    return %c0_i32, %c0_i32_0, %c0_i32_1 : i32, i32, i32
  }
  func.func @transform_16(%arg0: i32) -> (i32, i32, i32) {
    %c0_i32 = arith.constant 0 : i32
    %c0_i32_0 = arith.constant 0 : i32
    %c0_i32_1 = arith.constant 0 : i32
    %c0_i32_2 = arith.constant 0 : i32
    return %c0_i32, %c0_i32_0, %c0_i32_1 : i32, i32, i32
  }
  func.func @transform_17(%arg0: i32) -> (i32, i32, i32) {
    %c0_i32 = arith.constant 0 : i32
    %c0_i32_0 = arith.constant 0 : i32
    %c0_i32_1 = arith.constant 0 : i32
    %c0_i32_2 = arith.constant 0 : i32
    return %c0_i32, %c0_i32_0, %c0_i32_1 : i32, i32, i32
  }
  func.func @transform_18(%arg0: i32) -> (i32, i32, i32) {
    %c0_i32 = arith.constant 0 : i32
    %c0_i32_0 = arith.constant 0 : i32
    %c0_i32_1 = arith.constant 0 : i32
    %c0_i32_2 = arith.constant 0 : i32
    return %c0_i32, %c0_i32_0, %c0_i32_1 : i32, i32, i32
  }
  func.func @transform_19(%arg0: i32) -> (i32, i32, i32) {
    %c0_i32 = arith.constant 0 : i32
    %c0_i32_0 = arith.constant 0 : i32
    %c0_i32_1 = arith.constant 0 : i32
    %c0_i32_2 = arith.constant 0 : i32
    return %c0_i32, %c0_i32_0, %c0_i32_1 : i32, i32, i32
  }
  func.func @transform_20(%arg0: i32) -> (i32, i32, i32) {
    %c0_i32 = arith.constant 0 : i32
    %c0_i32_0 = arith.constant 0 : i32
    %c0_i32_1 = arith.constant 0 : i32
    %c0_i32_2 = arith.constant 0 : i32
    return %c0_i32, %c0_i32_0, %c0_i32_1 : i32, i32, i32
  }
  func.func @transform_21(%arg0: i32) -> (i32, i32, i32) {
    %c0_i32 = arith.constant 0 : i32
    %c0_i32_0 = arith.constant 0 : i32
    %c0_i32_1 = arith.constant 0 : i32
    %c0_i32_2 = arith.constant 0 : i32
    return %c0_i32, %c0_i32_0, %c0_i32_1 : i32, i32, i32
  }
  func.func @transform_22(%arg0: i32) -> (i32, i32, i32) {
    %c0_i32 = arith.constant 0 : i32
    %c0_i32_0 = arith.constant 0 : i32
    %c0_i32_1 = arith.constant 0 : i32
    %c0_i32_2 = arith.constant 0 : i32
    return %c0_i32, %c0_i32_0, %c0_i32_1 : i32, i32, i32
  }
  func.func @transform_23(%arg0: i32) -> (i32, i32, i32) {
    %c0_i32 = arith.constant 0 : i32
    %c0_i32_0 = arith.constant 0 : i32
    %c0_i32_1 = arith.constant 0 : i32
    %c0_i32_2 = arith.constant 0 : i32
    return %c0_i32, %c0_i32_0, %c0_i32_1 : i32, i32, i32
  }
  func.func @transform_24(%arg0: i32) -> (i32, i32, i32) {
    %c0_i32 = arith.constant 0 : i32
    %c0_i32_0 = arith.constant 0 : i32
    %c0_i32_1 = arith.constant 0 : i32
    %c0_i32_2 = arith.constant 0 : i32
    return %c0_i32, %c0_i32_0, %c0_i32_1 : i32, i32, i32
  }
  func.func @transform_25(%arg0: i32) -> (i32, i32, i32) {
    %c0_i32 = arith.constant 0 : i32
    %c0_i32_0 = arith.constant 0 : i32
    %c0_i32_1 = arith.constant 0 : i32
    %c0_i32_2 = arith.constant 0 : i32
    return %c0_i32, %c0_i32_0, %c0_i32_1 : i32, i32, i32
  }
  func.func @transform_26(%arg0: i32) -> (i32, i32) {
    %c0_i32 = arith.constant 0 : i32
    %c0_i32_0 = arith.constant 0 : i32
    %c0_i32_1 = arith.constant 0 : i32
    return %c0_i32, %c0_i32_0 : i32, i32
  }
  func.func @transform_27(%arg0: i32) -> (i32, i32) {
    %c0_i32 = arith.constant 0 : i32
    %c0_i32_0 = arith.constant 0 : i32
    %c0_i32_1 = arith.constant 0 : i32
    return %c0_i32, %c0_i32_0 : i32, i32
  }
  func.func @transform_28(%arg0: i32) -> (i32, i32) {
    %c0_i32 = arith.constant 0 : i32
    %c0_i32_0 = arith.constant 0 : i32
    return %arg0, %c0_i32 : i32, i32
  }
  func.func @transform_29(%arg0: i32) -> (i32, i32) {
    %c0_i32 = arith.constant 0 : i32
    %c0_i32_0 = arith.constant 0 : i32
    return %arg0, %c0_i32 : i32, i32
  }
}

</mosaic_0001>

<bundles_post_ra>
// kernel: strgqn_forward.1
= control target key start
LH: loop header
LB: loop body
LE: loop exit
PB: predicated region body
PF: predicated region fallthrough
CT: control target
= control target key end

     0   :  { %s3975_s6 = smov 1   ;;  %s3976_s10 = smov 2   ;;  %s4608_s0 = inlined_call_operand.smem [shape: u32[30], index: -1, kind: input, shape index: {}] }
   0x1   :  { %s4024_s5 = sld [smem:[%s4608_s0]]   ;;  %s3977_s14 = smov 3  }
   0x2   :  { %s4029_s9 = sld [smem:[%s4608_s0 + %s3975_s6]]   ;;  %s3978_s18 = smov 4  }
   0x3   :  { %s4034_s13 = sld [smem:[%s4608_s0 + %s3976_s10]]   ;;  %s3979_s22 = smov 5  }
   0x4   :  { %s4039_s17 = sld [smem:[%s4608_s0 + %s3977_s14]]   ;;  %s3980_s26 = smov 6  }
   0x5   :  { %s4044_s21 = sld [smem:[%s4608_s0 + %s3978_s18]]   ;;  %s3981_s30 = smov 7  }
   0x6   :  { %s4049_s25 = sld [smem:[%s4608_s0 + %s3979_s22]]   ;;  %s3982_s4 = smov 8  }
   0x7   :  { %4644 = sst [smem:[#allocation6_spill]] %s4024_s5  ;;  %s3983_s10 = smov 9  }
   0x8   :  { %4645 = sst [smem:[#allocation7_spill]] %s4029_s9  ;;  %s3984_s15 = smov 10  }
   0x9   :  { %4646 = sst [smem:[#allocation8_spill]] %s4034_s13  ;;  %s3985_s20 = smov 11  }
   0xa   :  { %4647 = sst [smem:[#allocation9_spill]] %s4039_s17  ;;  %s3987_s1 = smov 13  }
   0xb   :  { %4648 = sst [smem:[#allocation10_spill]] %s4044_s21  ;;  %s3988_s7 = smov 14  }
   0xc   :  { %4649 = sst [smem:[#allocation11_spill]] %s4049_s25  ;;  %s3990_s22 = smov 16  }
   0xd   :  { %s4054_s29 = sld [smem:[%s4608_s0 + %s3980_s26]]   ;;  %s3986_s26 = smov 12  }
   0xe   :  { %s4059_s3 = sld [smem:[%s4608_s0 + %s3981_s30]]   ;;  %s3991_s28 = smov 17  }
   0xf   :  { %s4064_s8 = sld [smem:[%s4608_s0 + %s3982_s4]]  }
  0x10   :  { %s4069_s14 = sld [smem:[%s4608_s0 + %s3983_s10]]  }
  0x11   :  { %s4074_s19 = sld [smem:[%s4608_s0 + %s3984_s15]]   ;;  %s3989_s15 = smov 15  }
  0x12   :  { %s4079_s24 = sld [smem:[%s4608_s0 + %s3985_s20]]  }
  0x13   :  { %s4084_s30 = sld [smem:[%s4608_s0 + %s3986_s26]]  }
  0x14   :  { %4650 = sst [smem:[#allocation12_spill]] %s4059_s3 }
  0x15   :  { %4651 = sst [smem:[#allocation13_spill]] %s4064_s8 }
  0x16   :  { %4652 = sst [smem:[#allocation14_spill]] %s4069_s14 }
  0x17   :  { %4653 = sst [smem:[#allocation15_spill]] %s4074_s19 }
  0x18   :  { %4654 = sst [smem:[#allocation16_spill]] %s4079_s24 }
  0x19   :  { %s4089_s6 = sld [smem:[%s4608_s0 + %s3987_s1]]  }
  0x1a   :  { %s4094_s12 = sld [smem:[%s4608_s0 + %s3988_s7]]   ;;  %s3992_s7 = smov 18  }
  0x1b   :  { %s4099_s20 = sld [smem:[%s4608_s0 + %s3989_s15]]   ;;  %s3993_s15 = smov 19  }
  0x1c   :  { %s4104_s27 = sld [smem:[%s4608_s0 + %s3990_s22]]   ;;  %s3994_s22 = smov 20  }
  0x1d   :  { %s4109_s4 = sld [smem:[%s4608_s0 + %s3991_s28]]   ;;  %s3995_s28 = smov 21  }
  0x1f   :  { %4655 = sst [smem:[#allocation17_spill]] %s4089_s6 }
  0x20   :  { %4656 = sst [smem:[#allocation18_spill]] %s4094_s12 }
  0x21   :  { %4657 = sst [smem:[#allocation19_spill]] %s4099_s20 }
  0x22   :  { %4658 = sst [smem:[#allocation20_spill]] %s4104_s27 }
  0x23   :  { %4659 = sst [smem:[#allocation21_spill]] %s4109_s4 }
  0x24   :  { %s4114_s6 = sld [smem:[%s4608_s0 + %s3992_s7]]   ;;  %s3996_s7 = smov 22  }
  0x25   :  { %s4119_s20 = sld [smem:[%s4608_s0 + %s3993_s15]]   ;;  %s3997_s15 = smov 23  }
  0x26   :  { %s4124_s27 = sld [smem:[%s4608_s0 + %s3994_s22]]   ;;  %s3998_s22 = smov 24  }
  0x27   :  { %s4129_s4 = sld [smem:[%s4608_s0 + %s3995_s28]]   ;;  %s3999_s28 = smov 25  }
  0x2a   :  { %4660 = sst [smem:[#allocation22_spill]] %s4114_s6 }
  0x2b   :  { %4661 = sst [smem:[#allocation23_spill]] %s4119_s20 }
  0x2c   :  { %4662 = sst [smem:[#allocation24_spill]] %s4124_s27 }
  0x2d   :  { %4663 = sst [smem:[#allocation25_spill]] %s4129_s4 }
  0x2e   :  { %s4134_s6 = sld [smem:[%s4608_s0 + %s3996_s7]]   ;;  %s4000_s7 = smov 26  }
  0x2f   :  { %s4139_s20 = sld [smem:[%s4608_s0 + %s3997_s15]]   ;;  %s4001_s15 = smov 27  }
  0x30   :  { %s4144_s27 = sld [smem:[%s4608_s0 + %s3998_s22]]   ;;  %s4002_s22 = smov 28  }
  0x31   :  { %s4149_s4 = sld [smem:[%s4608_s0 + %s3999_s28]]   ;;  %s4003_s28 = smov 29  }
  0x34   :  { %4664 = sst [smem:[#allocation26_spill]] %s4134_s6 }
  0x35   :  { %4665 = sst [smem:[#allocation27_spill]] %s4139_s20 }
  0x36   :  { %4666 = sst [smem:[#allocation28_spill]] %s4144_s27 }
  0x37   :  { %4667 = sst [smem:[#allocation29_spill]] %s4149_s4 }
  0x38   :  { %s4154_s6 = sld [smem:[%s4608_s0 + %s4000_s7]]  }
  0x39   :  { %s4159_s20 = sld [smem:[%s4608_s0 + %s4001_s15]]  }
  0x3a   :  { %s4164_s27 = sld [smem:[%s4608_s0 + %s4002_s22]]  }
  0x3b   :  { %s4169_s4 = sld [smem:[%s4608_s0 + %s4003_s28]]  }
  0x3e   :  { %4668 = sst [smem:[#allocation30_spill]] %s4154_s6 }
  0x3f   :  { %65 = vsyncpa [#allocation4], 0 }
  0x40   :  { %67 = vsyncpa [#allocation4 + $0x1], 0  ;;  %s4171_s7 = smov 0   ;;  %s4173_s10 = smov 0  }
  0x41   :  { %s4175_s11 = smov 0   ;;  %s4177_s15 = smov 0  }
  0x42 LB: > { %s4669_s24 = sld [smem:[#allocation16_spill]]  ;;  %s4670_s12 = sld [smem:[#allocation18_spill]]  ;;  %s3961_s7 = sphi %s4171_s7, %s4705_s7   ;;  %s3973_s15 = sphi %s4177_s15, %s4708_s15   ;;  %s3969_s11 = sphi %s4175_s11, %s4707_s11   ;;  %s3965_s10 = sphi %s4173_s10, %s4706_s10  }
  0x43   : > { %s4671_s17 = sld [smem:[#allocation9_spill]]  ;;  %s4672_s13 = sld [smem:[#allocation8_spill]] }
  0x44   : > { %s4673_s8 = sld [smem:[#allocation13_spill]]  ;;  %s4192_s0 = sadd.s32 4294967295, %s3973_s15  }
  0x45   : > { %s3271_s16 = sadd.s32 4294967294, %s3973_s15   ;;  %s4196_s18 = sadd.s32 1, %s3973_s15  }
  0x46   : > { %s347_s22 = sadd.s32 1, %s3969_s11  ;;  %s344_s23 = ssub.s32 %s3973_s15, %s4196_s18 }
  0x47   : > { %p354_p0 = scmp.ne.s32.totalorder %s3969_s11, %s3965_s10  ;;  %p345_p1 = scmp.eq.s32.totalorder %s344_s23, 0 }
  0x48   : > { %p355_p2 = scmp.eq.s32.totalorder %s3973_s15, 0  ;;  %p725_p3 = scmp.eq.s32.totalorder %s4192_s0, 1 }
  0x49   : > { %p730_p4 = scmp.ne.s32.totalorder %s3965_s10, %s3961_s7  ;;  %p731_p7 = scmp.eq.s32.totalorder %s3271_s16, 1 }
  0x4a   : > { %s4208_s26 = scalar_select %p345_p1, %s3969_s11, %s347_s22  }
  0x4b   : > { %p356_p5 = por %p355_p2, %p354_p0  ;;  %p4210_p6 = por %p725_p3, %p354_p0 }
  0x4c   : > { %4674 = sst [smem:[#allocation31_spill]] %s4208_s26  ;;  %p4214_p8 = por %p731_p7, %p730_p4 }
  0x4d   : > { %p4643_p9 = scmp.ge.s32.totalorder %s3973_s15, 2 }
  0x4f   : > { %819 = sbr.rel (%p4643_p9) target bundleno = 93 (0x5d), region = 112 }
  0x56   : > { %847 = sbr.rel (!%p356_p5) target bundleno = 93 (0x5d), region = 128  ;;  %s849_s2 = sand.u32 (%p356_p5), 1, %s3969_s11  }
  0x57   : > { %s3404_s22 = sshll.u32 (%p356_p5), %s3973_s15, 4  ;;  %s3274_s23 = sshll.u32 (%p356_p5), %s849_s2, 5 }
  0x58   : > { %s854_s26 = scalar_lea.vmem (%p356_p5), %s4084_s30, %s3404_s22  ;;  %s851_s16 = scalar_lea.vmem (%p356_p5), [#allocation2], %s3274_s23 }
  0x59   : > { %v888_v0 = vld [vmem:[%s854_s26] sm:$0xff] (%p356_p5)  ;;  %v890_v1 = vld [vmem:[%s854_s26 + $0x8] sm:$0xff] (%p356_p5) }
  0x5a   : > { %v892_v2 = vld [vmem:[%s854_s26 + $0x20] sm:$0xff] (%p356_p5)  ;;  %889 = vst [vmem:[%s851_s16] sm:$0xff] (%p356_p5), %v888_v0  ;;  %891 = vst [vmem:[%s851_s16 + $0x8] sm:$0xff] (%p356_p5), %v890_v1  ;;  %v894_v3 = vld [vmem:[%s854_s26 + $0x28] sm:$0xff] (%p356_p5) }
  0x5b   : > { %893 = vst [vmem:[%s851_s16 + $0x10] sm:$0xff] (%p356_p5), %v892_v2  ;;  %895 = vst [vmem:[%s851_s16 + $0x18] sm:$0xff] (%p356_p5), %v894_v3 }
  0x5d PF: > { %p3277_p10 = scmp.ge.s32.totalorder %s3973_s15, 1  ;;  %p900_p11 = scmp.lt.s32.totalorder %s3973_s15, 3 }
  0x5f   : > { %p901_p12 = pnand %p3277_p10, %p900_p11 }
  0x60   : > { %v1134_v4 = vld [vmem:[%s4054_s29] sm:$0xf] (!%p901_p12)  ;;  %vm1147_vm0 = vcmask (!%p901_p12), 1042432   ;;  %vm1148_vm1 = vcmask (!%p901_p12), 1043456   ;;  %v4004_v5 = vmov (!%p901_p12), 0.0   ;;  %s4677_s25 = sld [smem:[#allocation11_spill]] (!%p901_p12)  ;;  %v1287_v62 = vlaneseq (!%p901_p12) }
  0x61   : > { %904 = sbr.rel (%p901_p12) target bundleno = 5335 (0x14d7), region = 166  ;;  %3497 = vmatprep.subr.bf16.mxu1 (!%p901_p12), %v4004_v5  ;;  %v4005_v6 = vmov (!%p901_p12), 65535   ;;  %p1013_p13 = scmp.lt.s32.totalorder (!%p901_p12), %s4192_s0, 1  ;;  %3479 = vmatprep.subr.bf16.mxu0 (!%p901_p12), %v4004_v5  ;;  %vm4006_vm2 = vmmov (!%p901_p12), 0   ;;  %vm1143_vm3 = vcmask (!%p901_p12), 56320   ;;  %v3744_v10 = vld [vmem:[%s4673_s8] sm:$0xff] (!%p901_p12)  }
  0x62   : > { %v1149_v7 = vsel (!%p901_p12), %vm1147_vm0, 4294967295, %v4005_v6  ;;  %3499 = vmatprep.mubr.msk.bf16.mxu1 (!%p901_p12), %vm4006_vm2, %v4004_v5  ;;  %3485 = vmatprep.mubr.msk.bf16.mxu0 (!%p901_p12), %vm4006_vm2, %v4004_v5  ;;  %v3745_v13 = vld [vmem:[%s4673_s8 + $0x8] sm:$0xff] (!%p901_p12)   ;;  %v3746_v14 = vld [vmem:[%s4673_s8 + $0x10] sm:$0xff] (!%p901_p12)   ;;  %s4678_s5 = sld [smem:[#allocation6_spill]] (!%p901_p12)  ;;  %v3747_v15 = vld [vmem:[%s4673_s8 + $0x18] sm:$0xff] (!%p901_p12)   ;;  %s1001_s23 = smul.u32 (!%p901_p12), 6, %s4192_s0 }
  0x63   : > { %v1150_v8 = vsel (!%p901_p12), %vm1148_vm1, %v1149_v7, 0  ;;  %v3748_v16 = vld [vmem:[%s4671_s17] sm:$0xff] (!%p901_p12)   ;;  %v3749_v17 = vld [vmem:[%s4671_s17 + $0x8] sm:$0xff] (!%p901_p12)   ;;  %v3750_v18 = vld [vmem:[%s4671_s17 + $0x10] sm:$0xff] (!%p901_p12)   ;;  %s4679_s3 = sld [smem:[#allocation12_spill]] (!%p901_p12)  ;;  %vm1066_vm4 = vcmask (!%p901_p12), 392192  }
  0x64   : > { %v1152_v9 = vand.u32 (!%p901_p12), %v1150_v8, %v1134_v4  ;;  %3480 = vmatpush3.bf16.msra.mxu0 (!%p901_p12), %v3748_v16  ;;  %p1002_p0 = scmp.lt.s32.totalorder (!%p901_p12), %s1001_s23, 11  ;;  %s4680_s21 = sld [smem:[#allocation10_spill]] (!%p901_p12)  ;;  %vm1235_vm5 = vcmask (!%p901_p12), 523264   ;;  %v3751_v36 = vld [vmem:[%s4669_s24] sm:$0xff] (!%p901_p12)   ;;  %v3752_v37 = vld [vmem:[%s4669_s24 + $0x8] sm:$0xff] (!%p901_p12)   ;;  %v1288_v0 = vshrl.u32 (!%p901_p12), %v1287_v62, 7 }
  0x65   : > { %3481 = vmatprep.subr.bf16.mxu0 (!%p901_p12), %v4004_v5  ;;  %s4681_s14 = sld [smem:[#allocation14_spill]] (!%p901_p12)  ;;  %s4682_s19 = sld [smem:[#allocation15_spill]] (!%p901_p12)  ;;  %v4007_v60 = vmov (!%p901_p12), 1966171168   ;;  %vm1356_vm6 = vcmask (!%p901_p12), 261120   ;;  %vm1800_vm7 = vcmask (!%p901_p12), 64512  }
  0x66   : > { %3498 = vmatpush3.bf16.msra.mxu1 (!%p901_p12), %v1152_v9  ;;  %v1285_v61 = vunpack.c.l.s4 (!%p901_p12), %v4007_v60  ;;  %s4683_s9 = sld [smem:[#allocation7_spill]] (!%p901_p12)  ;;  %s4627_s8 = smov (!%p901_p12), 16   ;;  %vm1856_vm8 = vcmask (!%p901_p12), 130048  }
  0x67   : > { %3503 = vmatprep.subr.bf16.mxu1 (!%p901_p12), %v4004_v5  ;;  %s4629_s17 = smov (!%p901_p12), 8   ;;  %s4696_s24 = smov (!%p901_p12), 16  }
  0x68   : > { %s1014_s26 = scalar_select %p1013_p13, %s4192_s0, 1  ;;  %3482 = vmatpush3.bf16.msra.mxu0 %v3749_v17  ;;  %v1286_v63 = vunpack.c.0.s8 %v1285_v61 }
  0x69   : > { %s4710_s23 = smov (!%p1002_p0, %s1001_s23), 11  ;;  %3483 = vmatprep.subr.bf16.mxu0 %v4004_v5  ;;  %v3293_v28 = vld [vmem:[%s4679_s3] ss:$0 sm:$0xff]  ;;  %s4687_s3 = sld [smem:[#allocation21_spill]] }
  0x6a   : > { %s3283_s2 = sshll.u32 %s1014_s26, 2  ;;  %s3280_s16 = sshll.u32 %s4710_s23, 3  ;;  %v3286_v38 = vld [vmem:[%s4680_s21] ss:$0 sm:$0xff]  ;;  %v1289_v2 = vsub.s32 %v1286_v63, %v1288_v0 }
  0x6b   : > { %s1016_s22 = scalar_lea.vmem %s4677_s25, %s3283_s2  ;;  %s1005_s26 = scalar_lea.vmem %s4678_s5, %s3280_s16  ;;  %v3295_v1 = vld [vmem:[%s4681_s14] ss:$0 sm:$0xff] }
  0x6c   : > { %v1133_v11 = vld [vmem:[%s1016_s22] sm:$0xf]  ;;  %v1027_v20 = vld [vmem:[%s1005_s26 + $0x8] sm:$0xff]  ;;  %3484 = vmatpush3.bf16.msra.mxu0 %v3750_v18  ;;  %v1028_v22 = vld [vmem:[%s1005_s26 + $0x10] sm:$0xff]  ;;  %s3281_s2 = sshll.u32 %s4192_s0, 1  ;;  %s4684_s16 = sld [smem:[#allocation17_spill]] }
  0x6d   : > { %v1135_v12 = vpack.c.bf16 %v1133_v11, %v1133_v11  ;;  %v1026_v19 = vld [vmem:[%s1005_s26] sm:$0xff]  ;;  %v1029_v23 = vld [vmem:[%s1005_s26 + $0x18] sm:$0xff]  ;;  %v1031_v26 = vld [vmem:[%s1005_s26 + $0x28] sm:$0xff]  ;;  %p1008_p1 = scmp.lt.s32.totalorder %s3281_s2, 3  ;;  %s4688_s5 = sld [smem:[#allocation23_spill]] }
  0x6e   : > { %v1038_v21 = vpack.c.bf16 %v1027_v20, %v1026_v19  ;;  %v1039_v24 = vpack.c.bf16 %v1029_v23, %v1028_v22  ;;  %v1030_v25 = vld [vmem:[%s1005_s26 + $0x20] sm:$0xff]  ;;  %s4685_s26 = sld [smem:[#allocation19_spill]]  ;;  %s4691_s21 = sld [smem:[#allocation22_spill]] }
  0x6f   : > { %3500 = vmatmul.mubr.msk.bf16.vlgmr.msra.gmra.mrb[0].mxu1 %vm1143_vm3, %v1135_v12  ;;  %v1040_v27 = vpack.c.bf16 %v1031_v26, %v1030_v25  ;;  %v3407_v7 = vld [vmem:[%s4682_s19] sm:$0xff]   ;;  %s4712_s2 = smov (!%p1008_p1, %s3281_s2), 3  ;;  %s4690_s19 = sld [smem:[#allocation24_spill]] }
  0x70   : > { %3504 = vmatpush3.bf16.msra.mxu1 %v3744_v10  ;;  %3511 = vmatprep.mubr.msk.bf16.mxu1 %vm4006_vm2, %v4004_v5  ;;  %v1310_v10 = vsub.s32 0, %v1288_v0  ;;  %v3408_v12 = vunpack.c.l.bf16 %v3407_v7  ;;  %s4621_s22 = sshll.u32 %s4712_s2, 3  ;;  %s4697_s25 = smov 96  }
  0x71   : > { %3505 = vmatprep.subr.bf16.mxu1 %v4004_v5  ;;  %3486 = vmatmul.mubr.msk.bf16.vlgmr.msra.gmra.mrb[0].mxu0 %vm1066_vm4, %v1038_v21  ;;  %s1011_s23 = scalar_lea.vmem %s4683_s9, %s4621_s22  ;;  %s4623_s22 = smov 80  }
  0x72   : > { %3489 = vmatprep.mubr.msk.bf16.mxu0 %vm4006_vm2, %v4004_v5  ;;  %s4356_s9 = sand.u32 1, %s3965_s10   ;;  %s4700_s6 = sld [smem:[#allocation30_spill]] }
  0x74   : > { %3506 = vmatpush3.bf16.msra.mxu1 %v3745_v13 }
  0x75   : > { %3507 = vmatprep.subr.bf16.mxu1 %v4004_v5 }
  0x78   : > { %3508 = vmatpush3.bf16.msra.mxu1 %v3746_v14 }
  0x79   : > { %3509 = vmatprep.subr.bf16.mxu1 %v4004_v5  ;;  %3490 = vmatmul.mubr.msk.bf16.gmra.mrb[4].mxu0 %vm1066_vm4, %v1039_v24 }
  0x7a   : > { %3493 = vmatprep.mubr.msk.bf16.mxu0 %vm4006_vm2, %v4004_v5 }
  0x7c   : > { %3510 = vmatpush3.bf16.msra.mxu1 %v3747_v15  ;;  %v3409_v15 = vunpack.c.h.bf16 %v3407_v7 }
  0x7d   : > { %3515 = vmatprep.subr.bf16.mxu1 %v3751_v36 }
  0x81   : > { %3494 = vmatmul.mubr.msk.bf16.gmra.mrb[8].mxu0 %vm1066_vm4, %v1040_v27 }
 0x142   : > { %v1188_v29 = vpop.f32.mrb[0].mxu1 }
 0x143   : > { %v1189_v30 = vadd.f32 %v3293_v28, %v1188_v29  ;;  %v3501_v31 = vpop.f32.mrb[1].mxu1 }
 0x144   : > { %v1191_v32 = vpop.f32.mrb[2].mxu1  ;;  %v1110_v39 = vpop.f32.mrb[0].mxu0 }
 0x145   : > { %v1194_v33 = vmax.f32 %v1189_v30, 0.0  ;;  %v3502_v34 = vpop.f32.mrb[3].mxu1  ;;  %v1111_v40 = vadd.f32 %v3286_v38, %v1110_v39  ;;  %v3487_v41 = vpop.f32.mrb[1].mxu0 }
 0x146   : > { %v1113_v42 = vpop.f32.mrb[2].mxu0 }
 0x147   : > { %v1203_v35 = vpack.c.bf16 %v1194_v33, %v1194_v33  ;;  %v1114_v43 = vadd.f32 %v3286_v38, %v1113_v42  ;;  %v3488_v44 = vpop.f32.mrb[3].mxu0 }
 0x149   : > { %3512 = vmatmul.mubr.msk.bf16.vlgmr.msra.gmra.mrb[4].mxu1 %vm1235_vm5, %v1203_v35  ;;  %v1503_v48 = vpack.c.bf16 %v1114_v43, %v1111_v40 }
 0x14a   : > { %3516 = vmatpush3.bf16.msra.mxu1 %v3751_v36 }
 0x14b   : > { %3517 = vmatprep.subr.bf16.mxu1 %v3752_v37  ;;  %1509 = vxpose.xlu0.c.b16.start [1/3] (short) (narrow) %v1503_v48, 32 }
 0x14c   : > { %v1118_v45 = vpop.f32.mrb[4].mxu0 }
 0x14d   : > { %v1119_v46 = vadd.f32 %v3286_v38, %v1118_v45  ;;  %v3491_v47 = vpop.f32.mrb[5].mxu0 }
 0x14e   : > { %3518 = vmatpush3.bf16.msra.mxu1 %v3752_v37  ;;  %v1121_v49 = vpop.f32.mrb[6].mxu0 }
 0x14f   : > { %3537 = vmatprep.subr.bf16.mxu1 %v4004_v5  ;;  %v1122_v50 = vadd.f32 %v3286_v38, %v1121_v49  ;;  %v3492_v51 = vpop.f32.mrb[7].mxu0 }
 0x151   : > { %v1504_v55 = vpack.c.bf16 %v1122_v50, %v1119_v46 }
 0x153   : > { %1510 = vxpose.xlu0.c.b16.cont [2/3] (short) (narrow) %v1504_v55, 32 }
 0x154   : > { %v1126_v52 = vpop.f32.mrb[8].mxu0 }
 0x155   : > { %v1127_v53 = vadd.f32 %v3286_v38, %v1126_v52  ;;  %v3495_v54 = vpop.f32.mrb[9].mxu0 }
 0x156   : > { %v1129_v56 = vpop.f32.mrb[10].mxu0 }
 0x157   : > { %v1130_v57 = vadd.f32 %v3286_v38, %v1129_v56  ;;  %v3496_v58 = vpop.f32.mrb[11].mxu0 }
 0x159   : > { %v1505_v59 = vpack.c.bf16 %v1130_v57, %v1127_v53 }
 0x15b   : > { %1511 = vxpose.xlu0.c.b16.end [3/3] (short) (narrow) %v1505_v59, 32 }
 0x1b9   : > { %v1517_v35 = vpop.trf.xlu0 }
 0x1ba   : > { %3533 = vmatprep.mubr.msk.bf16.mxu0 %vm1066_vm4, %v1517_v35 }
 0x21c   : > { %v1273_v3 = vpop.f32.mrb[4].mxu1 }
 0x21d   : > { %v1274_v4 = vadd.f32 %v3295_v1, %v1273_v3  ;;  %v3513_v6 = vpop.f32.mrb[5].mxu1 }
 0x21e   : > { %v1276_v8 = vpop.f32.mrb[6].mxu1 }
 0x21f   : > { %v1290_v9 = vrot.slane %v1274_v4, %v1289_v2  ;;  %v3514_v11 = vpop.f32.mrb[7].mxu1 }
 0x221   : > { %v1291_v13 = vcombine.high %v1290_v9, %v1290_v9  ;;  %v1298_v14 = vrot.slane %v1290_v9, %v1289_v2 }
 0x223   : > { %v1305_v16 = vrot.slane %v1291_v13, %v1289_v2  ;;  %v1306_v17 = vcombine.high %v1298_v14, %v1298_v14  ;;  %v1311_v18 = vrot.slane %v1298_v14, %v1310_v10 }
 0x225   : > { %v1307_v19 = vcombine.high %v1305_v16, %v1305_v16  ;;  %v1315_v20 = vrot.slane %v1305_v16, %v1310_v10  ;;  %v1319_v21 = vrot.slane %v1306_v17, %v1310_v10  ;;  %v1328_v22 = vmul.f32 %v3408_v12, %v1311_v18 }
 0x226   : > { %v1329_v23 = vmul.f32 %v3409_v15, %v1311_v18 }
 0x227   : > { %v1330_v24 = vmul.f32 %v3408_v12, %v1315_v20  ;;  %v1331_v25 = vmul.f32 %v3409_v15, %v1315_v20  ;;  %v1332_v26 = vmul.f32 %v3408_v12, %v1319_v21  ;;  %v1333_v28 = vmul.f32 %v3409_v15, %v1319_v21 }
 0x228   : > { %v1340_v27 = vpack.c.bf16 %v1329_v23, %v1328_v22  ;;  %v1323_v29 = vrot.slane %v1307_v19, %v1310_v10 }
 0x229   : > { %v1341_v30 = vpack.c.bf16 %v1331_v25, %v1330_v24  ;;  %v1342_v31 = vpack.c.bf16 %v1333_v28, %v1332_v26 }
 0x22a   : > { %3519 = vmatprep.mubr.msk.bf16.mxu1 %vm1356_vm6, %v1340_v27  ;;  %v1334_v32 = vmul.f32 %v3408_v12, %v1323_v29  ;;  %v1335_v33 = vmul.f32 %v3409_v15, %v1323_v29 }
 0x22b   : > { %3520 = vmatmul.mubr.msk.bf16.vlgmr.msra.gmra.mrb[8].mxu1 %vm1356_vm6, %v1341_v30 }
 0x22c   : > { %3523 = vmatprep.mubr.msk.bf16.mxu1 %vm1356_vm6, %v1342_v31  ;;  %v1343_v34 = vpack.c.bf16 %v1335_v33, %v1334_v32 }
 0x233   : > { %3524 = vmatmul.mubr.msk.bf16.gmra.mrb[12].mxu1 %vm1356_vm6, %v1343_v34 }
 0x234   : > { %3541 = vmatprep.mubr.msk.bf16.mxu1 %vm4006_vm2, %v4004_v5 }
 0x2fe   : > { %v3521_v36 = vpop.f32.mrb[8].mxu1 }
 0x2ff   : > { %v1403_v37 = vpop.f32.mrb[9].mxu1 }
 0x300   : > { %v3522_v38 = vpop.f32.mrb[10].mxu1 }
 0x301   : > { %v1441_v39 = vmax.f32 %v3521_v36, %v3522_v38  ;;  %v1406_v40 = vpop.f32.mrb[11].mxu1 }
 0x302   : > { %v1434_v41 = vmax.f32 %v1403_v37, %v1406_v40 }
 0x303   : > { %v1442_v42 = vrot.slane %v1441_v39, 4 }
 0x304   : > { %v1435_v43 = vrot.slane %v1434_v41, 4 }
 0x305   : > { %v1443_v44 = vmax.f32 %v1441_v39, %v1442_v42 }
 0x306   : > { %v1436_v45 = vmax.f32 %v1434_v41, %v1435_v43  ;;  %v4275_v46 = vpop.f32.mrb[12].mxu1 }
 0x307   : > { %v1444_v47 = vrot.slane %v1443_v44, 2  ;;  %1604 = vmax.xlane.f32.xlu1 %v4275_v46  ;;  %v1419_v48 = vpop.f32.mrb[13].mxu1 }
 0x308   : > { %v1437_v49 = vrot.slane %v1436_v45, 2  ;;  %v4278_v50 = vpop.f32.mrb[14].mxu1 }
 0x309   : > { %v1445_v51 = vmax.f32 %v1443_v44, %v1444_v47  ;;  %v1422_v52 = vpop.f32.mrb[15].mxu1 }
 0x30a   : > { %v1438_v53 = vmax.f32 %v1436_v45, %v1437_v49  ;;  %v1448_v54 = vmax.f32 %v1419_v48, %v1422_v52 }
 0x30b   : > { %v1446_v55 = vrot.slane %v1445_v51, 1  ;;  %1606 = vmax.xlane.f32.xlu1 %v4278_v50 }
 0x30c   : > { %v1439_v56 = vrot.slane %v1438_v53, 1  ;;  %v1449_v57 = vrot.slane %v1448_v54, 4 }
 0x30d   : > { %v1447_v58 = vmax.f32 %v1445_v51, %v1446_v55  ;;  %v1518_v55 = vpop.trf.xlu0 }
 0x30e   : > { %v1440_v59 = vmax.f32 %v1438_v53, %v1439_v56  ;;  %v1450_v60 = vmax.f32 %v1448_v54, %v1449_v57 }
 0x30f   : > { %v1457_v61 = vsub.f32 %v3521_v36, %v1447_v58  ;;  %v1458_v62 = vsub.f32 %v3522_v38, %v1447_v58 }
 0x310   : > { %v1455_v63 = vsub.f32 %v1403_v37, %v1440_v59  ;;  %v1456_v0 = vsub.f32 %v1406_v40, %v1440_v59  ;;  %v1451_v1 = vrot.slane %v1450_v60, 2 }
 0x311   : > { %v1465_v2 = vmul.f32 1.442695, %v1457_v61  ;;  %v1467_v3 = vmul.f32 1.442695, %v1458_v62 }
 0x312   : > { %v1461_v4 = vmul.f32 1.442695, %v1455_v63  ;;  %v1463_v6 = vmul.f32 1.442695, %v1456_v0  ;;  %v1452_v7 = vmax.f32 %v1450_v60, %v1451_v1  ;;  %v3753_v0 = vld [vmem:[%s4672_s13] sm:$0xff]   ;;  %v3755_v1 = vld [vmem:[%s4672_s13 + $0x10] sm:$0xff]  }
 0x313   : > { %3773 = vpow2.f32 %v1465_v2  ;;  %v1667_v2 = vld [vmem:[%s1011_s23 + $0x8] sm:$0xff] }
 0x314   : > { %3775 = vpow2.f32 %v1467_v3  ;;  %v1453_v8 = vrot.slane %v1452_v7, 1 }
 0x315   : > { %3777 = vpow2.f32 %v1461_v4 }
 0x316   : > { %3779 = vpow2.f32 %v1463_v6  ;;  %v1454_v9 = vmax.f32 %v1452_v7, %v1453_v8 }
 0x318   : > { %v1459_v10 = vsub.f32 %v1419_v48, %v1454_v9  ;;  %v1460_v11 = vsub.f32 %v1422_v52, %v1454_v9 }
 0x31a   : > { %v1469_v12 = vmul.f32 1.442695, %v1459_v10  ;;  %v1471_v13 = vmul.f32 1.442695, %v1460_v11 }
 0x31c   : > { %3781 = vpow2.f32 %v1469_v12 }
 0x31d   : > { %v3774_v14 = vpop.eup %3773  ;;  %3783 = vpow2.f32 %v1471_v13 }
 0x31e   : > { %v3776_v15 = vpop.eup %3775 }
 0x31f   : > { %v3778_v16 = vpop.eup %3777  ;;  %v1480_v17 = vadd.f32 %v3776_v15, %v3774_v14 }
 0x320   : > { %v3780_v18 = vpop.eup %3779 }
 0x321   : > { %v1481_v19 = vrot.slane %v1480_v17, 4  ;;  %v1473_v20 = vadd.f32 %v3780_v18, %v3778_v16 }
 0x323   : > { %v1482_v21 = vadd.f32 %v1481_v19, %v1480_v17  ;;  %v1474_v22 = vrot.slane %v1473_v20, 4 }
 0x325   : > { %v1483_v23 = vrot.slane %v1482_v21, 2  ;;  %v1475_v24 = vadd.f32 %v1474_v22, %v1473_v20 }
 0x326   : > { %v3782_v25 = vpop.eup %3781 }
 0x327   : > { %v3784_v26 = vpop.eup %3783  ;;  %v1484_v27 = vadd.f32 %v1483_v23, %v1482_v21  ;;  %v1476_v28 = vrot.slane %v1475_v24, 2 }
 0x328   : > { %v1487_v29 = vadd.f32 %v3784_v26, %v3782_v25 }
 0x329   : > { %v1477_v30 = vadd.f32 %v1476_v28, %v1475_v24  ;;  %v1485_v31 = vrot.slane %v1484_v27, 1 }
 0x32a   : > { %v1488_v32 = vrot.slane %v1487_v29, 4 }
 0x32b   : > { %v1478_v33 = vrot.slane %v1477_v30, 1  ;;  %v1486_v34 = vadd.f32 %v1485_v31, %v1484_v27 }
 0x32c   : > { %v1489_v35 = vadd.f32 %v1488_v32, %v1487_v29 }
 0x32d   : > { %v1479_v36 = vadd.f32 %v1478_v33, %v1477_v30  ;;  %3785 = vrcp.f32 %v1486_v34  ;;  %v3756_v33 = vld [vmem:[%s4670_s12] sm:$0xff]  }
 0x32e   : > { %v1490_v37 = vrot.slane %v1489_v35, 2 }
 0x32f   : > { %3787 = vrcp.f32 %v1479_v36  ;;  %v3757_v36 = vld [vmem:[%s4670_s12 + $0x8] sm:$0xff]  }
 0x330   : > { %v1491_v38 = vadd.f32 %v1490_v37, %v1489_v35  ;;  %v1737_v37 = vld [vmem:[%s4684_s16] sm:$0xf] }
 0x332   : > { %v1492_v39 = vrot.slane %v1491_v38, 1 }
 0x334   : > { %v1493_v40 = vadd.f32 %v1492_v39, %v1491_v38  ;;  %v1805_v39 = vsel %vm1148_vm1, %v1737_v37, 0 }
 0x336   : > { %3789 = vrcp.f32 %v1493_v40 }
 0x337   : > { %v3786_v41 = vpop.eup %3785 }
 0x338   : > { %v1499_v42 = vmul.f32 %v3786_v41, %v3774_v14  ;;  %v1500_v43 = vmul.f32 %v3786_v41, %v3776_v15 }
 0x339   : > { %v3788_v44 = vpop.eup %3787 }
 0x33a   : > { %v1497_v45 = vmul.f32 %v3788_v44, %v3778_v16  ;;  %v1498_v47 = vmul.f32 %v3788_v44, %v3780_v18  ;;  %v1507_v48 = vpack.c.bf16 %v1500_v43, %v1499_v42 }
 0x33c   : > { %v1506_v49 = vpack.c.bf16 %v1498_v47, %v1497_v45  ;;  %v3758_v47 = vld [vmem:[%s4685_s26] sm:$0xff]  }
 0x33e   : > { %3527 = vmatprep.subr.bf16.mxu0 %v1506_v49 }
 0x33f   : > { %3528 = vmatpush3.bf16.msra.mxu0 %v1506_v49 }
 0x340   : > { %v3790_v51 = vpop.eup %3789  ;;  %3529 = vmatprep.subr.bf16.mxu0 %v1507_v48 }
 0x341   : > { %v1501_v52 = vmul.f32 %v3790_v51, %v3782_v25  ;;  %v1502_v53 = vmul.f32 %v3790_v51, %v3784_v26  ;;  %v4008_v51 = vmov 0  }
 0x343   : > { %3530 = vmatpush3.bf16.msra.mxu0 %v1507_v48  ;;  %v1508_v54 = vpack.c.bf16 %v1502_v53, %v1501_v52 }
 0x345   : > { %3531 = vmatprep.subr.bf16.mxu0 %v1508_v54 }
 0x347   : > { %3532 = vmatpush3.bf16.msra.mxu0 %v1508_v54 }
 0x348   : > { %3545 = vmatprep.subr.bf16.mxu0 %v4004_v5 }
 0x34a   : > { %3534 = vmatmul.mubr.msk.bf16.vlgmr.msra.gmra.mrb[12].mxu0 %vm1066_vm4, %v1518_v55 }
 0x34b   : > { %3551 = vmatprep.mubr.msk.bf16.mxu0 %vm4006_vm2, %v4004_v5  ;;  %3546 = vmatpush3.bf16.msra.mxu0 %v3753_v0 }
 0x34c   : > { %3547 = vmatprep.subr.bf16.mxu0 %v4004_v5 }
 0x394   : > { %v1605_v56 = vpop.xlane.xlu1 %1604 }
 0x395   : > { %v1608_v57 = vsub.f32 %v4275_v46, %v1605_v56  ;;  %v3754_v46 = vld [vmem:[%s4672_s13 + $0x8] sm:$0xff]   ;;  %s3278_s13 = sshll.u32 %s4356_s9, 5 }
 0x396   : > { %3548 = vmatpush3.bf16.msra.mxu0 %v3754_v46  ;;  %s4359_s14 = scalar_lea.vmem [#allocation2], %s3278_s13  ;;  %s4692_s13 = sld [smem:[#allocation25_spill]] }
 0x397   : > { %v1610_v58 = vmul.f32 1.442695, %v1608_v57  ;;  %3549 = vmatprep.subr.bf16.mxu0 %v4004_v5 }
 0x398   : > { %v1607_v59 = vpop.xlane.xlu1 %1606 }
 0x399   : > { %3791 = vpow2.f32 %v1610_v58  ;;  %v1609_v60 = vsub.f32 %v4278_v50, %v1607_v59  ;;  %v1666_v50 = vld [vmem:[%s1011_s23] sm:$0xff]  ;;  %s4686_s23 = sld [smem:[#allocation20_spill]] }
 0x39a   : > { %3550 = vmatpush3.bf16.msra.mxu0 %v3755_v1  ;;  %v1674_v3 = vpack.c.bf16 %v1667_v2, %v1666_v50 }
 0x39b   : > { %v1612_v61 = vmul.f32 1.442695, %v1609_v60  ;;  %3563 = vmatprep.subr.bf16.mxu0 %v4004_v5 }
 0x39d   : > { %3793 = vpow2.f32 %v1612_v61  ;;  %3552 = vmatmul.mubr.msk.bf16.vlgmr.msra.gmra.mrb[16].mxu0 %vm1066_vm4, %v1674_v3 }
 0x39e   : > { %3565 = vmatprep.mubr.msk.bf16.mxu0 %vm4006_vm2, %v4004_v5  ;;  %3564 = vmatpush3.bf16.msra.mxu0 %v1805_v39 }
 0x39f   : > { %3575 = vmatprep.subr.bf16.mxu0 %v4004_v5 }
 0x3a3   : > { %v4287_v62 = vpop.eup %3791 }
 0x3a4   : > { %1614 = vadd.xlane.f32.xlu1 %v4287_v62 }
 0x3a7   : > { %v3794_v63 = vpop.eup %3793 }
 0x3a8   : > { %1616 = vadd.xlane.f32.xlu0 %v3794_v63 }
 0x41d   : > { %v3535_v4 = vpop.f32.mrb[12].mxu0 }
 0x41e   : > { %v3311_v6 = vmul.f32 -1.442695, %v3535_v4  ;;  %v1565_v7 = vpop.f32.mrb[13].mxu0 }
 0x41f   : > { %v3309_v8 = vmul.f32 -1.442695, %v1565_v7  ;;  %v3536_v9 = vpop.f32.mrb[14].mxu0 }
 0x420   : > { %3795 = vpow2.f32 %v3311_v6  ;;  %v3312_v10 = vmul.f32 -1.442695, %v3536_v9  ;;  %v1568_v11 = vpop.f32.mrb[15].mxu0 }
 0x421   : > { %3797 = vpow2.f32 %v3309_v8  ;;  %v3310_v12 = vmul.f32 -1.442695, %v1568_v11 }
 0x422   : > { %3799 = vpow2.f32 %v3312_v10 }
 0x423   : > { %3801 = vpow2.f32 %v3310_v12 }
 0x42a   : > { %v3796_v13 = vpop.eup %3795 }
 0x42b   : > { %v3798_v14 = vpop.eup %3797  ;;  %v1594_v15 = vadd.f32 1.0, %v3796_v13 }
 0x42c   : > { %v3800_v16 = vpop.eup %3799  ;;  %v1592_v17 = vadd.f32 1.0, %v3798_v14 }
 0x42d   : > { %v3802_v18 = vpop.eup %3801  ;;  %3803 = vrcp.f32 %v1594_v15  ;;  %v1595_v19 = vadd.f32 1.0, %v3800_v16 }
 0x42e   : > { %3805 = vrcp.f32 %v1592_v17  ;;  %v1593_v20 = vadd.f32 1.0, %v3802_v18 }
 0x42f   : > { %3807 = vrcp.f32 %v1595_v19 }
 0x430   : > { %3809 = vrcp.f32 %v1593_v20 }
 0x431   : > { %v1615_v24 = vpop.xlane.xlu1 %1614 }
 0x435   : > { %v1617_v21 = vpop.xlane.xlu0 %1616 }
 0x436   : > { %3811 = vrcp.f32 %v1617_v21 }
 0x437   : > { %v3804_v22 = vpop.eup %3803  ;;  %3813 = vrcp.f32 %v1615_v24 }
 0x438   : > { %v3806_v23 = vpop.eup %3805 }
 0x439   : > { %v3808_v25 = vpop.eup %3807 }
 0x43a   : > { %v3810_v26 = vpop.eup %3809  ;;  %v1624_v27 = vpack.c.bf16 %v3808_v25, %v3804_v22 }
 0x43b   : > { %v1623_v28 = vpack.c.bf16 %v3810_v26, %v3806_v23  ;;  %v3759_v26 = vld [vmem:[%s4687_s3] sm:$0xff]  }
 0x43d   : > { %3538 = vmatpush3.bf16.xpose.msra.mxu1 %v1623_v28 }
 0x43e   : > { %3539 = vmatprep.subr.bf16.mxu1 %v4004_v5 }
 0x440   : > { %v3812_v29 = vpop.eup %3811 }
 0x441   : > { %v3814_v30 = vpop.eup %3813  ;;  %v1621_v31 = vmul.f32 %v3812_v29, %v3794_v63  ;;  %v3322_v63 = vld [vmem:[%s4686_s23] ss:$0 sm:$0xff] }
 0x442   : > { %v1620_v32 = vmul.f32 %v3814_v30, %v4287_v62 }
 0x444   : > { %v1622_v34 = vpack.c.bf16 %v1621_v31, %v1620_v32 }
 0x445   : > { %3540 = vmatpush3.bf16.xpose.msra.mxu1 %v1624_v27  ;;  %v3760_v27 = vld [vmem:[%s4688_s5] sm:$0xff]  }
 0x446   : > { %3555 = vmatprep.subr.bf16.mxu1 %v4004_v5 }
 0x44c   : > { %3542 = vmatmul.mubr.bf16.vlgmr.msra.gmra.mrb[16].mxu1 %v1622_v34 }
 0x44d   : > { %3556 = vmatpush3.bf16.msra.mxu1 %v3756_v33  ;;  %3559 = vmatprep.mubr.msk.bf16.mxu1 %vm4006_vm2, %v4004_v5 }
 0x44e   : > { %3557 = vmatprep.subr.bf16.mxu1 %v4004_v5 }
 0x451   : > { %3558 = vmatpush3.bf16.msra.mxu1 %v3757_v36  ;;  %v2086_v36 = vld [vmem:[%s4359_s14 + $0x8] sm:$0xff] }
 0x452   : > { %3569 = vmatprep.subr.bf16.mxu1 %v4004_v5 }
 0x470   : > { %v1730_v35 = vpop.f32.mrb[16].mxu0 }
 0x471   : > { %v3553_v38 = vpop.f32.mrb[17].mxu0 }
 0x472   : > { %v1733_v40 = vpop.f32.mrb[18].mxu0 }
 0x473   : > { %v4316_v41 = vpack.c.bf16 %v1733_v40, %v1730_v35  ;;  %v3554_v42 = vpop.f32.mrb[19].mxu0  ;;  %v2085_v35 = vld [vmem:[%s4359_s14] sm:$0xff] }
 0x475   : > { %3566 = vmatmul.mubr.msk.bf16.vlgmr.msra.gmra.mrb[20].mxu0 %vm1800_vm7, %v4316_v41 }
 0x476   : > { %3577 = vmatprep.mubr.msk.bf16.mxu0 %vm4006_vm2, %v4004_v5  ;;  %3576 = vmatpush3.bf16.msra.mxu0 %v3759_v26 }
 0x477   : > { %3587 = vmatprep.subr.bf16.mxu0 %v4004_v5 }
 0x51f   : > { %v1659_v43 = vpop.f32.mrb[16].mxu1 }
 0x520   : > { %v3543_v44 = vpop.f32.mrb[17].mxu1 }
 0x521   : > { %v1662_v45 = vpop.f32.mrb[18].mxu1 }
 0x522   : > { %v4325_v48 = vpack.c.bf16 %v1662_v45, %v1659_v43  ;;  %v3544_v49 = vpop.f32.mrb[19].mxu1  ;;  %v4380_v43 = vld [vmem:[%s4690_s19] ss:$0 sm:$0xff] }
 0x523   : > { %v3325_v49 = vld [vmem:[%s4691_s21] ss:$0 sm:$0xff] }
 0x524   : > { %3560 = vmatmul.mubr.msk.bf16.vlgmr.msra.gmra.mrb[20].mxu1 %vm1356_vm6, %v4325_v48 }
 0x525   : > { %3570 = vmatpush3.bf16.msra.mxu1 %v3758_v47  ;;  %3571 = vmatprep.mubr.msk.bf16.mxu1 %vm4006_vm2, %v4004_v5 }
 0x526   : > { %3581 = vmatprep.subr.bf16.mxu1 %v4004_v5 }
 0x52c   : > { %3572 = vmatmul.mubr.bf16.vlgmr.msra.gmra.mrb[24].mxu1 %v4008_v51 }
 0x52d   : > { %3583 = vmatprep.mubr.msk.bf16.mxu1 %vm4006_vm2, %v4004_v5  ;;  %3582 = vmatpush3.bf16.msra.mxu1 %v3760_v27 }
 0x52e   : > { %3595 = vmatprep.subr.bf16.mxu1 %v4004_v5 }
 0x534   : > { %3584 = vmatmul.mubr.bf16.vlgmr.msra.gmra.mrb[28].mxu1 %v4008_v51 }
 0x535   : > { %3597 = vmatprep.mubr.msk.bf16.mxu1 %vm4006_vm2, %v4004_v5 }
 0x548   : > { %v1841_v52 = vpop.f32.mrb[20].mxu0 }
 0x549   : > { %v3567_v53 = vpop.f32.mrb[21].mxu0 }
 0x54a   : > { %v1844_v54 = vpop.f32.mrb[22].mxu0 }
 0x54b   : > { %v3568_v55 = vpop.f32.mrb[23].mxu0 }
 0x5f7   : > { %v1793_v56 = vpop.f32.mrb[20].mxu1 }
 0x5f8   : > { %v1842_v57 = vadd.f32 %v1841_v52, %v1793_v56  ;;  %v3561_v58 = vpop.f32.mrb[21].mxu1 }
 0x5f9   : > { %v1796_v59 = vpop.f32.mrb[22].mxu1 }
 0x5fa   : > { %v1845_v60 = vadd.f32 %v1844_v54, %v1796_v59  ;;  %v3562_v61 = vpop.f32.mrb[23].mxu1 }
 0x5ff   : > { %v1894_v62 = vpop.f32.mrb[24].mxu1 }
 0x600   : > { %v1901_v0 = vadd.f32 %v1894_v62, %v1842_v57  ;;  %v3573_v46 = vpop.f32.mrb[25].mxu1 }
 0x601   : > { %v1897_v1 = vpop.f32.mrb[26].mxu1 }
 0x602   : > { %v1910_v50 = vadd.f32 %v3322_v63, %v1901_v0  ;;  %v1902_v2 = vadd.f32 %v1897_v1, %v1845_v60  ;;  %v3574_v3 = vpop.f32.mrb[27].mxu1 }
 0x604   : > { %3815 = vtanh.f32 %v1910_v50  ;;  %v1911_v4 = vadd.f32 %v3322_v63, %v1902_v2  ;;  %v3323_v8 = vmul.f32 -1.442695, %v1910_v50  ;;  %v2107_v63 = vld [vmem:[%s4692_s13] sm:$0xf] }
 0x605   : > { %v2170_v46 = vsel %vm1148_vm1, %v2107_v63, 0 }
 0x606   : > { %3817 = vtanh.f32 %v1911_v4  ;;  %v3324_v9 = vmul.f32 -1.442695, %v1911_v4  ;;  %3596 = vmatpush3.bf16.msra.mxu1 %v2170_v46 }
 0x607   : > { %3819 = vpow2.f32 %v3323_v8  ;;  %v4377_v40 = vpop.f32.mrb[28].mxu1  ;;  %3607 = vmatprep.subr.bf16.mxu1 %v4004_v5 }
 0x608   : > { %3821 = vpow2.f32 %v3324_v9  ;;  %v3585_v42 = vpop.f32.mrb[29].mxu1 }
 0x609   : > { %v2075_v44 = vpop.f32.mrb[30].mxu1 }
 0x60a   : > { %v4383_v45 = vadd.f32 %v4380_v43, %v2075_v44  ;;  %v3586_v47 = vpop.f32.mrb[31].mxu1 }
 0x60e   : > { %v3816_v6 = vpop.eup %3815 }
 0x60f   : > { %1930 = vrot.lane.b32.xlu1 %v3816_v6, %s4623_s22 }
 0x610   : > { %v3818_v7 = vpop.eup %3817 }
 0x611   : > { %1932 = vrot.lane.b32.xlu0 %v3818_v7, %s4623_s22  ;;  %v3820_v10 = vpop.eup %3819  ;;  %s4689_s22 = sld [smem:[#allocation26_spill]] }
 0x612   : > { %v1918_v11 = vadd.f32 1.0, %v3820_v10  ;;  %v3822_v12 = vpop.eup %3821 }
 0x613   : > { %v1919_v13 = vadd.f32 1.0, %v3822_v12  ;;  %v3763_v12 = vld [vmem:[%s4670_s12 + $0x10] sm:$0xff]  }
 0x614   : > { %3823 = vrcp.f32 %v1918_v11 }
 0x615   : > { %3825 = vrcp.f32 %v1919_v13  ;;  %2089 = vrot.lane.b32.xlu0 %v2085_v35, %s4629_s17 }
 0x617   : > { %v3761_v37 = vld [vmem:[%s4689_s22] sm:$0xff]   ;;  %v3762_v39 = vld [vmem:[%s4689_s22 + $0x8] sm:$0xff]  }
 0x61e   : > { %v3824_v14 = vpop.eup %3823 }
 0x61f   : > { %v3826_v18 = vpop.eup %3825  ;;  %v1926_v20 = vmul.f32 0.0, %v3824_v14 }
 0x620   : > { %v1927_v23 = vmul.f32 0.0, %v3826_v18 }
 0x681   : > { %v1931_v15 = vpop.permute.xlu1 %1930 }
 0x682   : > { %v1936_v16 = vmul.f32 %v3824_v14, %v1931_v15 }
 0x683   : > { %v1933_v17 = vpop.permute.xlu0 %1932 }
 0x684   : > { %1940 = vrot.lane.b32.xlu1 %v1936_v16, %s4627_s8  ;;  %v1937_v19 = vmul.f32 %v3826_v18, %v1933_v17 }
 0x687   : > { %v2090_v50 = vpop.permute.xlu0 %2089 }
 0x688   : > { %1942 = vrot.lane.b32.xlu1 %v1937_v19, %s4627_s8 }
 0x6f6   : > { %v1941_v21 = vpop.permute.xlu1 %1940 }
 0x6f7   : > { %v4340_v22 = vadd.f32 %v1941_v21, %v1926_v20 }
 0x6f9   : > { %3827 = vtanh.f32 %v4340_v22 }
 0x6fa   : > { %v1943_v24 = vpop.permute.xlu1 %1942 }
 0x6fb   : > { %v4343_v25 = vadd.f32 %v1943_v24, %v1927_v23 }
 0x6fd   : > { %3829 = vtanh.f32 %v4343_v25 }
 0x703   : > { %v3828_v28 = vpop.eup %3827 }
 0x704   : > { %1952 = vrot.lane.b32.xlu1 %v3828_v28, %s4627_s8 }
 0x707   : > { %v3830_v29 = vpop.eup %3829 }
 0x708   : > { %1954 = vrot.lane.b32.xlu1 %v3830_v29, %s4627_s8  ;;  %s4631_s8 = smov 96  }
 0x776   : > { %v1953_v30 = vpop.permute.xlu1 %1952 }
 0x777   : > { %v1958_v32 = vmul.f32 %v3824_v14, %v1953_v30  ;;  %v3764_v14 = vld [vmem:[%s4670_s12 + $0x18] sm:$0xff]   ;;  %s4695_s12 = sld [smem:[#allocation28_spill]] }
 0x77a   : > { %v1955_v31 = vpop.permute.xlu1 %1954 }
 0x77b   : > { %v1959_v33 = vmul.f32 %v3826_v18, %v1955_v31 }
 0x77d   : > { %v1962_v34 = vpack.c.bf16 %v1959_v33, %v1958_v32 }
 0x77f   : > { %1971 = vrot.lane.b32.xlu1 %v1962_v34, %s4631_s8  ;;  %s4693_s8 = sld [smem:[#allocation27_spill]] }
 0x783   : > { %2091 = vrot.lane.b32.xlu1 %v2086_v36, %s4629_s17  ;;  %s4633_s17 = smov 120  }
 0x785   : > { %v3334_v16 = vld [vmem:[%s4693_s8] ss:$0 sm:$0xff] }
 0x7f1   : > { %v1972_v38 = vpop.permute.xlu1 %1971 }
 0x7f2   : > { %3578 = vmatmul.mubr.msk.bf16.vlgmr.msra.gmra.mrb[24].mxu0 %vm1856_vm8, %v1972_v38 }
 0x7f3   : > { %3588 = vmatpush3.bf16.msra.mxu0 %v3761_v37  ;;  %3591 = vmatprep.mubr.msk.bf16.mxu0 %vm4006_vm2, %v4004_v5 }
 0x7f4   : > { %3589 = vmatprep.subr.bf16.mxu0 %v4004_v5 }
 0x7f5   : > { %v2092_v3 = vpop.permute.xlu1 %2091 }
 0x7f7   : > { %3590 = vmatpush3.bf16.msra.mxu0 %v3762_v39 }
 0x7f8   : > { %3601 = vmatprep.subr.bf16.mxu0 %v4004_v5 }
 0x7fa   : > { %3592 = vmatmul.mubr.msk.bf16.vlgmr.msra.gmra.mrb[28].mxu0 %vm1356_vm6, %v4325_v48 }
 0x7fb   : > { %3603 = vmatprep.mubr.msk.bf16.mxu0 %vm4006_vm2, %v4004_v5 }
 0x8c5   : > { %v2016_v51 = vpop.f32.mrb[24].mxu0 }
 0x8c6   : > { %v4386_v52 = vadd.f32 %v3325_v49, %v2016_v51  ;;  %v3579_v53 = vpop.f32.mrb[25].mxu0 }
 0x8c7   : > { %v2019_v54 = vpop.f32.mrb[26].mxu0 }
 0x8c8   : > { %v4388_v55 = vadd.f32 %v3325_v49, %v2019_v54  ;;  %v3580_v56 = vpop.f32.mrb[27].mxu0  ;;  %v2079_v57 = vmul.f32 0.5, %v4386_v52 }
 0x8ca   : > { %v2081_v58 = vmul.f32 1.442695, %v2079_v57  ;;  %v2080_v59 = vmul.f32 0.5, %v4388_v55 }
 0x8cc   : > { %3831 = vpow2.f32 %v2081_v58  ;;  %v2083_v60 = vmul.f32 1.442695, %v2080_v59  ;;  %v3765_v59 = vld [vmem:[%s4695_s12] sm:$0xff]  }
 0x8cd   : > { %v2159_v61 = vpop.f32.mrb[28].mxu0  ;;  %3602 = vmatpush3.bf16.msra.mxu0 %v3765_v59 }
 0x8ce   : > { %v3593_v62 = vpop.f32.mrb[29].mxu0  ;;  %3833 = vpow2.f32 %v2083_v60  ;;  %v3766_v60 = vld [vmem:[%s4685_s26 + $0x8] sm:$0xff]   ;;  %3615 = vmatprep.subr.bf16.mxu0 %v4004_v5 }
 0x8cf   : > { %v2162_v0 = vpop.f32.mrb[30].mxu0 }
 0x8d0   : > { %v3594_v1 = vpop.f32.mrb[31].mxu0 }
 0x8d6   : > { %v3832_v2 = vpop.eup %3831 }
 0x8d7   : > { %v2095_v4 = vmul.f32 %v3832_v2, %v2090_v50  ;;  %v3342_v2 = vld [vmem:[%s4684_s16 + $0x4] sm:$0xf] }
 0x8d8   : > { %v3834_v6 = vpop.eup %3833 }
 0x8d9   : > { %v2096_v7 = vmul.f32 %v3834_v6, %v2092_v3  ;;  %2099 = vrot.lane.b32.xlu0 %v2095_v4, %s4633_s17  ;;  %v3767_v3 = vld [vmem:[%s4688_s5 + $0x8] sm:$0xff]   ;;  %v2430_v4 = vsel %vm1148_vm1, %v3342_v2, 0  ;;  %s4698_s5 = smov 8  }
 0x8db   : > { %2101 = vrot.lane.b32.xlu1 %v2096_v7, %s4633_s17  ;;  %s4694_s17 = smov 80  }
 0x94b   : > { %v2100_v8 = vpop.permute.xlu0 %2099 }
 0x94c   : > { %v2105_v10 = vadd.f32 %v2100_v8, %v4386_v52 }
 0x94d   : > { %v2102_v9 = vpop.permute.xlu1 %2101 }
 0x94e   : > { %v2106_v11 = vadd.f32 %v2102_v9, %v4388_v55 }
 0x950   : > { %v2108_v13 = vpack.c.bf16 %v2106_v11, %v2105_v10 }
 0x952   : > { %3598 = vmatmul.mubr.msk.bf16.vlgmr.msra.gmra.mrb[32].mxu1 %vm1800_vm7, %v2108_v13 }
 0x953   : > { %3608 = vmatpush3.bf16.msra.mxu1 %v3763_v12  ;;  %3611 = vmatprep.mubr.msk.bf16.mxu1 %vm4006_vm2, %v4004_v5 }
 0x954   : > { %3609 = vmatprep.subr.bf16.mxu1 %v4004_v5 }
 0x957   : > { %3610 = vmatpush3.bf16.msra.mxu1 %v3764_v14 }
 0x958   : > { %3621 = vmatprep.subr.bf16.mxu1 %v4004_v5 }
 0x95a   : > { %3612 = vmatmul.mubr.msk.bf16.vlgmr.msra.gmra.mrb[36].mxu1 %vm1356_vm6, %v4325_v48 }
 0x95b   : > { %3623 = vmatprep.mubr.msk.bf16.mxu1 %vm4006_vm2, %v4004_v5  ;;  %3622 = vmatpush3.bf16.msra.mxu1 %v3766_v60 }
 0x95c   : > { %3633 = vmatprep.subr.bf16.mxu1 %v4004_v5 }
 0xa25   : > { %v2206_v15 = vpop.f32.mrb[32].mxu1 }
 0xa26   : > { %v2207_v17 = vadd.f32 %v2206_v15, %v2159_v61  ;;  %v3599_v18 = vpop.f32.mrb[33].mxu1 }
 0xa27   : > { %v2209_v19 = vpop.f32.mrb[34].mxu1 }
 0xa28   : > { %v2220_v20 = vadd.f32 %v3334_v16, %v2207_v17  ;;  %v2210_v21 = vadd.f32 %v2209_v19, %v2162_v0  ;;  %v3600_v23 = vpop.f32.mrb[35].mxu1  ;;  %v3356_v19 = vld [vmem:[%s4686_s23 + $0x1] ss:$0 sm:$0xff] }
 0xa2a   : > { %3835 = vtanh.f32 %v2220_v20  ;;  %v2221_v24 = vadd.f32 %v3334_v16, %v2210_v21  ;;  %v3335_v32 = vmul.f32 -1.442695, %v2220_v20  ;;  %v4459_v20 = vld [vmem:[%s4690_s19 + $0x1] ss:$0 sm:$0xff] }
 0xa2c   : > { %3837 = vtanh.f32 %v2221_v24  ;;  %v3336_v33 = vmul.f32 -1.442695, %v2221_v24 }
 0xa2d   : > { %v4411_v26 = vpop.f32.mrb[36].mxu1  ;;  %3839 = vpow2.f32 %v3335_v32 }
 0xa2e   : > { %v3613_v27 = vpop.f32.mrb[37].mxu1  ;;  %3841 = vpow2.f32 %v3336_v33 }
 0xa2f   : > { %v4413_v28 = vpop.f32.mrb[38].mxu1 }
 0xa30   : > { %v3614_v29 = vpop.f32.mrb[39].mxu1 }
 0xa34   : > { %v3836_v30 = vpop.eup %3835 }
 0xa35   : > { %2240 = vrot.lane.b32.xlu0 %v3836_v30, %s4694_s17 }
 0xa36   : > { %v3838_v31 = vpop.eup %3837 }
 0xa37   : > { %2242 = vrot.lane.b32.xlu1 %v3838_v31, %s4694_s17  ;;  %v3840_v34 = vpop.eup %3839 }
 0xa38   : > { %v3842_v35 = vpop.eup %3841  ;;  %v2228_v36 = vadd.f32 1.0, %v3840_v34 }
 0xa39   : > { %v2229_v37 = vadd.f32 1.0, %v3842_v35 }
 0xa3a   : > { %3843 = vrcp.f32 %v2228_v36 }
 0xa3b   : > { %3845 = vrcp.f32 %v2229_v37 }
 0xa44   : > { %v3844_v38 = vpop.eup %3843 }
 0xa45   : > { %v3846_v44 = vpop.eup %3845  ;;  %v2236_v51 = vmul.f32 0.0, %v3844_v38 }
 0xa46   : > { %v2237_v56 = vmul.f32 0.0, %v3846_v44 }
 0xaa7   : > { %v2241_v39 = vpop.permute.xlu0 %2240 }
 0xaa8   : > { %v2246_v42 = vmul.f32 %v3844_v38, %v2241_v39 }
 0xaa9   : > { %v2243_v47 = vpop.permute.xlu1 %2242 }
 0xaaa   : > { %2250 = vrot.lane.b32.xlu0 %v2246_v42, %s4696_s24  ;;  %v2247_v49 = vmul.f32 %v3846_v44, %v2243_v47 }
 0xaac   : > { %2252 = vrot.lane.b32.xlu1 %v2247_v49, %s4696_s24 }
 0xb1c   : > { %v2251_v53 = vpop.permute.xlu0 %2250 }
 0xb1d   : > { %v4419_v54 = vadd.f32 %v2251_v53, %v2236_v51 }
 0xb1e   : > { %v2253_v57 = vpop.permute.xlu1 %2252 }
 0xb1f   : > { %3847 = vtanh.f32 %v4419_v54  ;;  %v4422_v58 = vadd.f32 %v2253_v57, %v2237_v56 }
 0xb21   : > { %3849 = vtanh.f32 %v4422_v58 }
 0xb29   : > { %v3848_v61 = vpop.eup %3847 }
 0xb2a   : > { %2262 = vrot.lane.b32.xlu0 %v3848_v61, %s4696_s24 }
 0xb2b   : > { %v3850_v62 = vpop.eup %3849 }
 0xb2c   : > { %2264 = vrot.lane.b32.xlu1 %v3850_v62, %s4696_s24 }
 0xb9c   : > { %v2263_v63 = vpop.permute.xlu0 %2262 }
 0xb9d   : > { %v2268_v46 = vmul.f32 %v3844_v38, %v2263_v63 }
 0xb9e   : > { %v2265_v0 = vpop.permute.xlu1 %2264 }
 0xb9f   : > { %v2269_v1 = vmul.f32 %v3846_v44, %v2265_v0  ;;  %v3768_v0 = vld [vmem:[%s4687_s3 + $0x8] sm:$0xff]  }
 0xba1   : > { %v2272_v50 = vpack.c.bf16 %v2269_v1, %v2268_v46 }
 0xba3   : > { %2281 = vrot.lane.b32.xlu0 %v2272_v50, %s4697_s25 }
 0xc15   : > { %v2282_v6 = vpop.permute.xlu0 %2281 }
 0xc16   : > { %3604 = vmatmul.mubr.msk.bf16.vlgmr.msra.gmra.mrb[32].mxu0 %vm1856_vm8, %v2282_v6  ;;  %3624 = vmatmul.mubr.msk.bf16.vlgmr.msra.gmra.mrb[40].mxu1 %vm1856_vm8, %v2282_v6 }
 0xc17   : > { %3616 = vmatpush3.bf16.msra.mxu0 %v2430_v4  ;;  %3634 = vmatpush3.bf16.msra.mxu1 %v3767_v3 }
 0xc18   : > { %3617 = vmatprep.mubr.msk.bf16.mxu0 %vm4006_vm2, %v4004_v5  ;;  %3635 = vmatprep.mubr.msk.bf16.mxu1 %vm4006_vm2, %v4004_v5 }
 0xc19   : > { %3627 = vmatprep.subr.bf16.mxu0 %v4004_v5  ;;  %3647 = vmatprep.subr.bf16.mxu1 %v4004_v5 }
 0xc1e   : > { %3618 = vmatmul.mubr.msk.bf16.vlgmr.msra.gmra.mrb[36].mxu0 %vm1800_vm7, %v4316_v41  ;;  %3636 = vmatmul.mubr.msk.bf16.vlgmr.msra.gmra.mrb[44].mxu1 %vm1856_vm8, %v2282_v6  ;;  %v3372_v6 = vld [vmem:[%s4359_s14 + $0x18] sm:$0xff] }
 0xc1f   : > { %3629 = vmatprep.mubr.msk.bf16.mxu0 %vm4006_vm2, %v4004_v5  ;;  %3649 = vmatprep.mubr.msk.bf16.mxu1 %vm4006_vm2, %v4004_v5 }
 0xc20   : > { %3628 = vmatpush3.bf16.msra.mxu0 %v3768_v0 }
 0xc21   : > { %3639 = vmatprep.subr.bf16.mxu0 %v4004_v5 }
 0xce9   : > { %v4450_v7 = vpop.f32.mrb[32].mxu0  ;;  %v2516_v8 = vpop.f32.mrb[40].mxu1 }
 0xcea   : > { %v3605_v9 = vpop.f32.mrb[33].mxu0  ;;  %v3625_v10 = vpop.f32.mrb[41].mxu1 }
 0xceb   : > { %v4452_v11 = vpop.f32.mrb[34].mxu0  ;;  %v2519_v12 = vpop.f32.mrb[42].mxu1  ;;  %v3770_v10 = vld [vmem:[%s4689_s22 + $0x18] sm:$0xff]  }
 0xcec   : > { %v3606_v13 = vpop.f32.mrb[35].mxu0  ;;  %v3626_v41 = vpop.f32.mrb[43].mxu1 }
 0xcf1   : > { %v2466_v14 = vpop.f32.mrb[36].mxu0  ;;  %v4454_v15 = vpop.f32.mrb[44].mxu1 }
 0xcf2   : > { %v2467_v16 = vadd.f32 %v2466_v14, %v4411_v26  ;;  %v3619_v17 = vpop.f32.mrb[37].mxu0  ;;  %v3637_v18 = vpop.f32.mrb[45].mxu1 }
 0xcf3   : > { %v2469_v21 = vpop.f32.mrb[38].mxu0  ;;  %v2702_v23 = vpop.f32.mrb[46].mxu1 }
 0xcf4   : > { %v2523_v24 = vadd.f32 %v2516_v8, %v2467_v16  ;;  %v2470_v27 = vadd.f32 %v2469_v21, %v4413_v28  ;;  %v4463_v29 = vadd.f32 %v4459_v20, %v2702_v23  ;;  %v3620_v30 = vpop.f32.mrb[39].mxu0  ;;  %v3638_v31 = vpop.f32.mrb[47].mxu1  ;;  %v3769_v8 = vld [vmem:[%s4689_s22 + $0x10] sm:$0xff]  }
 0xcf5   : > { %v3373_v31 = vld [vmem:[%s4692_s13 + $0x4] sm:$0xf] }
 0xcf6   : > { %v2533_v32 = vadd.f32 %v3356_v19, %v2523_v24  ;;  %v2524_v33 = vadd.f32 %v2519_v12, %v2470_v27  ;;  %v3362_v12 = vld [vmem:[%s4691_s21 + $0x1] ss:$0 sm:$0xff] }
 0xcf8   : > { %3851 = vtanh.f32 %v2533_v32  ;;  %v2534_v34 = vadd.f32 %v3356_v19, %v2524_v33  ;;  %v3357_v36 = vmul.f32 -1.442695, %v2533_v32  ;;  %v2800_v33 = vsel %vm1148_vm1, %v3373_v31, 0 }
 0xcf9   : > { %3648 = vmatpush3.bf16.msra.mxu1 %v2800_v33 }
 0xcfa   : > { %3853 = vtanh.f32 %v2534_v34  ;;  %v3358_v37 = vmul.f32 -1.442695, %v2534_v34  ;;  %3659 = vmatprep.subr.bf16.mxu1 %v4004_v5 }
 0xcfb   : > { %3855 = vpow2.f32 %v3357_v36 }
 0xcfc   : > { %3857 = vpow2.f32 %v3358_v37 }
 0xd02   : > { %v3852_v26 = vpop.eup %3851 }
 0xd03   : > { %2553 = vrot.lane.b32.xlu1 %v3852_v26, %s4694_s17 }
 0xd04   : > { %v3854_v35 = vpop.eup %3853 }
 0xd05   : > { %2555 = vrot.lane.b32.xlu0 %v3854_v35, %s4694_s17  ;;  %v3856_v28 = vpop.eup %3855 }
 0xd06   : > { %v3858_v38 = vpop.eup %3857  ;;  %v2541_v39 = vadd.f32 1.0, %v3856_v28 }
 0xd07   : > { %v2542_v42 = vadd.f32 1.0, %v3858_v38 }
 0xd08   : > { %3859 = vrcp.f32 %v2541_v39 }
 0xd09   : > { %3861 = vrcp.f32 %v2542_v42 }
 0xd12   : > { %v3860_v44 = vpop.eup %3859 }
 0xd13   : > { %v3862_v51 = vpop.eup %3861  ;;  %v2549_v57 = vmul.f32 %v3860_v44, %v4340_v22 }
 0xd14   : > { %v2550_v61 = vmul.f32 %v3862_v51, %v4343_v25  ;;  %v3371_v25 = vld [vmem:[%s4359_s14 + $0x10] sm:$0xff]  ;;  %s4699_s14 = smov 120  }
 0xd75   : > { %v2554_v47 = vpop.permute.xlu1 %2553 }
 0xd76   : > { %v2559_v49 = vmul.f32 %v3860_v44, %v2554_v47 }
 0xd77   : > { %v2556_v53 = vpop.permute.xlu0 %2555 }
 0xd78   : > { %2563 = vrot.lane.b32.xlu1 %v2559_v49, %s4696_s24  ;;  %v2560_v56 = vmul.f32 %v3862_v51, %v2556_v53 }
 0xd7a   : > { %2565 = vrot.lane.b32.xlu0 %v2560_v56, %s4696_s24 }
 0xdea   : > { %v2564_v59 = vpop.permute.xlu1 %2563 }
 0xdeb   : > { %v2569_v60 = vadd.f32 %v2564_v59, %v2549_v57 }
 0xdec   : > { %v2566_v62 = vpop.permute.xlu0 %2565 }
 0xded   : > { %3863 = vtanh.f32 %v2569_v60  ;;  %v2570_v63 = vadd.f32 %v2566_v62, %v2550_v61 }
 0xdef   : > { %3865 = vtanh.f32 %v2570_v63 }
 0xdf7   : > { %v3864_v46 = vpop.eup %3863 }
 0xdf8   : > { %2575 = vrot.lane.b32.xlu1 %v3864_v46, %s4696_s24 }
 0xdf9   : > { %v3866_v1 = vpop.eup %3865 }
 0xdfa   : > { %2577 = vrot.lane.b32.xlu0 %v3866_v1, %s4696_s24 }
 0xdfe   : > { %2717 = vrot.lane.b32.xlu0 %v3371_v25, %s4698_s5 }
 0xe6a   : > { %v2576_v22 = vpop.permute.xlu1 %2575 }
 0xe6b   : > { %v2581_v2 = vmul.f32 %v3860_v44, %v2576_v22 }
 0xe6c   : > { %v2578_v50 = vpop.permute.xlu0 %2577 }
 0xe6d   : > { %v2582_v3 = vmul.f32 %v3862_v51, %v2578_v50  ;;  %v3383_v51 = vld [vmem:[%s4693_s8 + $0x1] ss:$0 sm:$0xff] }
 0xe6f   : > { %v2586_v4 = vpack.c.bf16 %v2582_v3, %v2581_v2 }
 0xe70   : > { %v2718_v34 = vpop.permute.xlu0 %2717 }
 0xe71   : > { %2596 = vrot.lane.b32.xlu1 %v2586_v4, %s4697_s25 }
 0xe75   : > { %2719 = vrot.lane.b32.xlu1 %v3372_v6, %s4698_s5 }
 0xee3   : > { %v2597_v9 = vpop.permute.xlu1 %2596 }
 0xee4   : > { %3630 = vmatmul.mubr.msk.bf16.vlgmr.msra.gmra.mrb[40].mxu0 %vm1856_vm8, %v2597_v9 }
 0xee5   : > { %3640 = vmatpush3.bf16.msra.mxu0 %v3769_v8  ;;  %3643 = vmatprep.mubr.msk.bf16.mxu0 %vm4006_vm2, %v4004_v5 }
 0xee6   : > { %3641 = vmatprep.subr.bf16.mxu0 %v4004_v5 }
 0xee7   : > { %v2720_v35 = vpop.permute.xlu1 %2719 }
 0xee9   : > { %3642 = vmatpush3.bf16.msra.mxu0 %v3770_v10 }
 0xeea   : > { %3653 = vmatprep.subr.bf16.mxu0 %v4004_v5 }
 0xeec   : > { %3644 = vmatmul.mubr.msk.bf16.vlgmr.msra.gmra.mrb[44].mxu0 %vm1356_vm6, %v4325_v48 }
 0xeed   : > { %3655 = vmatprep.mubr.msk.bf16.mxu0 %vm4006_vm2, %v4004_v5 }
 0xfb7   : > { %v2641_v13 = vpop.f32.mrb[40].mxu0 }
 0xfb8   : > { %v4492_v41 = vadd.f32 %v3362_v12, %v2641_v13  ;;  %v3631_v14 = vpop.f32.mrb[41].mxu0 }
 0xfb9   : > { %v2644_v16 = vpop.f32.mrb[42].mxu0 }
 0xfba   : > { %v4494_v17 = vadd.f32 %v3362_v12, %v2644_v16  ;;  %v3632_v18 = vpop.f32.mrb[43].mxu0  ;;  %v2706_v19 = vmul.f32 0.5, %v4492_v41 }
 0xfbc   : > { %v2708_v21 = vmul.f32 1.442695, %v2706_v19  ;;  %v2707_v23 = vmul.f32 0.5, %v4494_v17  ;;  %v2073_v19 = vadd.f32 %v4380_v43, %v4377_v40  ;;  %v2335_v43 = vmul.f32 1.442695, %v4386_v52 }
 0xfbe   : > { %3867 = vpow2.f32 %v2708_v21  ;;  %v2710_v48 = vmul.f32 1.442695, %v2707_v23  ;;  %v2339_v23 = vsub.f32 %v4386_v52, %v2073_v19  ;;  %v2353_v40 = vsub.f32 0.0, %v2073_v19 }
 0xfbf   : > { %v2789_v24 = vpop.f32.mrb[44].mxu0 }
 0xfc0   : > { %v3645_v27 = vpop.f32.mrb[45].mxu0  ;;  %3869 = vpow2.f32 %v2710_v48  ;;  %v2355_v31 = vmul.f32 1.442695, %v2353_v40 }
 0xfc1   : > { %v2792_v30 = vpop.f32.mrb[46].mxu0 }
 0xfc2   : > { %v3646_v32 = vpop.f32.mrb[47].mxu0 }
 0xfc8   : > { %v3868_v26 = vpop.eup %3867 }
 0xfc9   : > { %v2723_v36 = vmul.f32 %v3868_v26, %v2718_v34 }
 0xfca   : > { %v3870_v37 = vpop.eup %3869 }
 0xfcb   : > { %v2724_v28 = vmul.f32 %v3870_v37, %v2720_v35  ;;  %2727 = vrot.lane.b32.xlu0 %v2723_v36, %s4699_s14  ;;  %v2340_v37 = vsub.f32 %v4388_v55, %v4383_v45 }
 0xfcd   : > { %2729 = vrot.lane.b32.xlu1 %v2724_v28, %s4699_s14 }
0x103d   : > { %v2728_v38 = vpop.permute.xlu0 %2727 }
0x103e   : > { %v2733_v42 = vadd.f32 %v2728_v38, %v4492_v41 }
0x103f   : > { %v2730_v39 = vpop.permute.xlu1 %2729 }
0x1040   : > { %v2734_v44 = vadd.f32 %v2730_v39, %v4494_v17 }
0x1042   : > { %v2737_v47 = vpack.c.bf16 %v2734_v44, %v2733_v42  ;;  %v2333_v44 = vsub.f32 %v2073_v19, %v4386_v52 }
0x1044   : > { %3650 = vmatmul.mubr.msk.bf16.vlgmr.msra.gmra.mrb[48].mxu1 %vm1800_vm7, %v2737_v47 }
0x1045   : > { %3661 = vmatprep.mubr.msk.bf16.mxu1 %vm4006_vm2, %v4004_v5 }
0x1117   : > { %v2836_v49 = vpop.f32.mrb[48].mxu1 }
0x1118   : > { %v2837_v53 = vadd.f32 %v2836_v49, %v2789_v24  ;;  %v3651_v56 = vpop.f32.mrb[49].mxu1  ;;  %v2342_v49 = vmul.f32 %v2340_v37, %v2340_v37 }
0x1119   : > { %v2839_v57 = vpop.f32.mrb[50].mxu1 }
0x111a   : > { %v2851_v59 = vadd.f32 %v3383_v51, %v2837_v53  ;;  %v2840_v60 = vadd.f32 %v2839_v57, %v2792_v30  ;;  %v3652_v61 = vpop.f32.mrb[51].mxu1  ;;  %v3771_v30 = vld [vmem:[%s4695_s12 + $0x8] sm:$0xff]   ;;  %s4014_s12 = smov [#allocation3]  }
0x111b   : > { %3654 = vmatpush3.bf16.msra.mxu0 %v3771_v30  ;;  %s3915_s13 = sshll.u32 %s4014_s12, 4  ;;  %s3916_s13 = int_to_ptr.vmem [resolvable:$false] %s3915_s13 }
0x111c   : > { %3871 = vtanh.f32 %v2851_v59  ;;  %v2852_v62 = vadd.f32 %v3383_v51, %v2840_v60  ;;  %v3384_v46 = vmul.f32 -1.442695, %v2851_v59  ;;  %v2977_v51 = vsub.f32 %v4494_v17, %v4463_v29  ;;  %s3917_s16 = scalar_lea.vmem %s3916_s13, 512 }
0x111e   : > { %3873 = vtanh.f32 %v2852_v62  ;;  %v3385_v1 = vmul.f32 -1.442695, %v2852_v62 }
0x111f   : > { %3875 = vpow2.f32 %v3384_v46 }
0x1120   : > { %3877 = vpow2.f32 %v3385_v1 }
0x1126   : > { %v3872_v63 = vpop.eup %3871 }
0x1127   : > { %2871 = vrot.lane.b32.xlu0 %v3872_v63, %s4694_s17  ;;  %v2979_v63 = vmul.f32 %v2977_v51, %v2977_v51 }
0x1128   : > { %v3874_v0 = vpop.eup %3873 }
0x1129   : > { %2873 = vrot.lane.b32.xlu1 %v3874_v0, %s4694_s17  ;;  %v3876_v5 = vpop.eup %3875  ;;  %s4701_s17 = sld [smem:[#allocation29_spill]] }
0x112a   : > { %v3878_v22 = vpop.eup %3877  ;;  %v2859_v50 = vadd.f32 1.0, %v3876_v5 }
0x112b   : > { %v2860_v25 = vadd.f32 1.0, %v3878_v22 }
0x112c   : > { %3879 = vrcp.f32 %v2859_v50  ;;  %v2354_v50 = vsub.f32 0.0, %v4383_v45 }
0x112d   : > { %3881 = vrcp.f32 %v2860_v25  ;;  %v2337_v25 = vmul.f32 1.442695, %v4388_v55 }
0x1136   : > { %v3880_v2 = vpop.eup %3879 }
0x1137   : > { %v3882_v6 = vpop.eup %3881  ;;  %v2867_v10 = vmul.f32 %v3880_v2, %v4419_v54  ;;  %v2700_v54 = vadd.f32 %v4459_v20, %v4454_v15  ;;  %v2972_v15 = vmul.f32 1.442695, %v4492_v41 }
0x1138   : > { %v2868_v14 = vmul.f32 %v3882_v6, %v4422_v58  ;;  %v2341_v58 = vmul.f32 %v2339_v23, %v2339_v23 }
0x1139   : > { %v2976_v24 = vsub.f32 %v4492_v41, %v2700_v54  ;;  %v2990_v32 = vsub.f32 0.0, %v2700_v54  ;;  %v2970_v61 = vsub.f32 %v2700_v54, %v4492_v41  ;;  %v2974_v41 = vmul.f32 1.442695, %v4494_v17 }
0x113b   : > { %v2978_v27 = vmul.f32 %v2976_v24, %v2976_v24  ;;  %v2992_v20 = vmul.f32 1.442695, %v2990_v32 }
0x1199   : > { %v2872_v3 = vpop.permute.xlu0 %2871 }
0x119a   : > { %v2877_v4 = vmul.f32 %v3880_v2, %v2872_v3  ;;  %v2991_v3 = vsub.f32 0.0, %v4463_v29 }
0x119b   : > { %v2874_v8 = vpop.permute.xlu1 %2873 }
0x119c   : > { %2881 = vrot.lane.b32.xlu0 %v2877_v4, %s4696_s24  ;;  %v2878_v9 = vmul.f32 %v3882_v6, %v2874_v8  ;;  %v2994_v4 = vmul.f32 1.442695, %v2991_v3 }
0x119e   : > { %2883 = vrot.lane.b32.xlu1 %v2878_v9, %s4696_s24 }
0x120e   : > { %v2882_v12 = vpop.permute.xlu0 %2881 }
0x120f   : > { %v2887_v13 = vadd.f32 %v2882_v12, %v2867_v10 }
0x1210   : > { %v2884_v16 = vpop.permute.xlu1 %2883 }
0x1211   : > { %3883 = vtanh.f32 %v2887_v13  ;;  %v2888_v18 = vadd.f32 %v2884_v16, %v2868_v14  ;;  %v2334_v13 = vsub.f32 %v4383_v45, %v4388_v55 }
0x1213   : > { %3885 = vtanh.f32 %v2888_v18 }
0x1214   : > { %3887 = vpow2.f32 %v2335_v43  ;;  %v3772_v43 = vld [vmem:[%s4700_s6] sm:$0xff]   ;;  %s3096_s6 = scalar_lea.sflag [#allocation4], %s4356_s9 }
0x1215   : > { %3889 = vpow2.f32 %v2355_v31  ;;  %3660 = vmatpush3.bf16.msra.mxu1 %v3772_v43 }
0x1216   : > { %3891 = vpow2.f32 %v2972_v15 }
0x1217   : > { %3893 = vpow2.f32 %v2992_v20 }
0x1218   : > { %3895 = vpow2.f32 %v2337_v25 }
0x121b   : > { %v3884_v21 = vpop.eup %3883 }
0x121c   : > { %2893 = vrot.lane.b32.xlu0 %v3884_v21, %s4696_s24 }
0x121d   : > { %v3886_v48 = vpop.eup %3885 }
0x121e   : > { %2895 = vrot.lane.b32.xlu1 %v3886_v48, %s4696_s24  ;;  %v3888_v28 = vpop.eup %3887  ;;  %v2971_v48 = vsub.f32 %v4463_v29, %v4494_v17  ;;  %v3337_v29 = vld [vmem:[%s4701_s17] ss:$0 sm:$0xff] }
0x121f   : > { %v3890_v42 = vpop.eup %3889  ;;  %v2327_v17 = vadd.f32 %v3337_v29, %v4450_v7  ;;  %v2330_v15 = vadd.f32 %v3337_v29, %v4452_v11 }
0x1220   : > { %v3892_v53 = vpop.eup %3891 }
0x1221   : > { %v3894_v60 = vpop.eup %3893 }
0x1222   : > { %2345 = vrot.lane.b32.xlu1 %v2341_v58, %s4698_s5  ;;  %v3896_v8 = vpop.eup %3895 }
0x1226   : > { %2982 = vrot.lane.b32.xlu1 %v2978_v27, %s4698_s5 }
0x128e   : > { %v2894_v33 = vpop.permute.xlu0 %2893 }
0x128f   : > { %v2899_v26 = vmul.f32 %v3880_v2, %v2894_v33  ;;  %v2357_v2 = vmul.f32 1.442695, %v2354_v50 }
0x1290   : > { %v2896_v34 = vpop.permute.xlu1 %2895 }
0x1291   : > { %v2900_v35 = vmul.f32 %v3882_v6, %v2896_v34  ;;  %3897 = vpow2.f32 %v2357_v2  ;;  %v3391_v34 = vld [vmem:[%s4701_s17 + $0x1] ss:$0 sm:$0xff] }
0x1292   : > { %3899 = vpow2.f32 %v2974_v41 }
0x1293   : > { %v2904_v36 = vpack.c.bf16 %v2900_v35, %v2899_v26  ;;  %3901 = vpow2.f32 %v2994_v4 }
0x1294   : > { %v2346_v38 = vpop.permute.xlu1 %2345 }
0x1295   : > { %v2351_v39 = vadd.f32 %v3888_v28, %v2346_v38  ;;  %2906 = vrot.lane.b32.xlu0 %v2904_v36, %s4697_s25  ;;  %s3279_s25 = sshll.u32 %s4356_s9, 4 }
0x1296   : > { %s1000_s24 = scalar_lea.vmem [#allocation3], %s3279_s25  ;;  %s3405_s25 = sshll.u32 %s4192_s0, 8 }
0x1297   : > { %v2359_v47 = vmul.f32 %v3890_v42, %v2351_v39  ;;  %s4561_s3 = scalar_lea.hbm %s4169_s4, %s3405_s25 }
0x1298   : > { %v2983_v56 = vpop.permute.xlu1 %2982 }
0x1299   : > { %v2361_v57 = vadd.f32 %v2359_v47, %v2333_v44  ;;  %v2988_v59 = vadd.f32 %v3892_v53, %v2983_v56  ;;  %2347 = vrot.lane.b32.xlu0 %v2342_v49, %s4698_s5 }
0x129b   : > { %v2996_v62 = vmul.f32 %v3894_v60, %v2988_v59  ;;  %v3340_v0 = vadd.f32 -1.0, %v2361_v57  ;;  %v3898_v12 = vpop.eup %3897 }
0x129c   : > { %v3900_v16 = vpop.eup %3899 }
0x129d   : > { %v2998_v46 = vadd.f32 %v2996_v62, %v2970_v61  ;;  %2984 = vrot.lane.b32.xlu0 %v2979_v63, %s4698_s5  ;;  %v2365_v1 = vmul.f32 0.5, %v3340_v0  ;;  %v3902_v23 = vpop.eup %3901 }
0x129f   : > { %v3392_v52 = vadd.f32 -1.0, %v2998_v46 }
0x12a1   : > { %v3002_v5 = vmul.f32 0.5, %v3392_v52 }
0x12a3   : > { %v3004_v22 = vadd.f32 %v3002_v5, %v2365_v1 }
0x12a5   : > { %3082 = vrot.lane.b32.xlu1 %v3004_v22, %s4699_s14 }
0x1307   : > { %v2907_v6 = vpop.permute.xlu0 %2906 }
0x1308   : > { %3656 = vmatmul.mubr.msk.bf16.vlgmr.msra.gmra.mrb[48].mxu0 %vm1856_vm8, %v2907_v6 }
0x130b   : > { %v2348_v9 = vpop.permute.xlu0 %2347 }
0x130c   : > { %v2352_v10 = vadd.f32 %v3896_v8, %v2348_v9 }
0x130e   : > { %v2360_v14 = vmul.f32 %v3898_v12, %v2352_v10 }
0x130f   : > { %v2985_v18 = vpop.permute.xlu0 %2984 }
0x1310   : > { %v2362_v19 = vadd.f32 %v2360_v14, %v2334_v13  ;;  %v2989_v21 = vadd.f32 %v3900_v16, %v2985_v18 }
0x1312   : > { %v2997_v54 = vmul.f32 %v3902_v23, %v2989_v21  ;;  %v3341_v58 = vadd.f32 -1.0, %v2362_v19 }
0x1314   : > { %v2999_v24 = vadd.f32 %v2997_v54, %v2971_v48  ;;  %v2366_v40 = vmul.f32 0.5, %v3341_v58 }
0x1316   : > { %v3393_v27 = vadd.f32 -1.0, %v2999_v24 }
0x1317   : > { %v3083_v30 = vpop.permute.xlu1 %3082 }
0x1318   : > { %v3003_v45 = vmul.f32 0.5, %v3393_v27  ;;  %3088 = vst.msk [vmem:[%s1000_s24] sm:$0xff] %vm1800_vm7, %v3083_v30 }
0x131a   : > { %v3005_v55 = vadd.f32 %v3003_v45, %v2366_v40 }
0x131c   : > { %3084 = vrot.lane.b32.xlu0 %v3005_v55, %s4699_s14  ;;  %s3113_s14 = sshll.u32 %s1000_s24, 4  ;;  %s4557_s14 = int_to_ptr.vmem [resolvable:$true] %s3113_s14 }
0x131d   : > { %s3911_s8 = scalar_lea.vmem %s4557_s14, 256  ;;  %p3918_p5 = scmp.lt.s32.totalorder %s4557_s14, %s3916_s13 }
0x131e   : > { %p3912_p2 = scmp.ne.s32.totalorder %s4557_s14, %s3911_s8  ;;  %p3919_p7 = scmp.lt.s32.totalorder %s3917_s16, %s3911_s8 }
0x1320   : > { %p3913_p3 = pnand %p3912_p2, %p4210_p6  ;;  %p3920_p10 = por %p3919_p7, %p3918_p5 }
0x1322   : > { %p3914_p4 = pneg %p3913_p3 }
0x1324   : > { %p3921_p11 = pnand %p3920_p10, %p3914_p4 }
0x138e   : > { %v3085_v31 = vpop.permute.xlu0 %3084 }
0x138f   : > { %3089 = vst.msk [vmem:[%s1000_s24 + $0x8] sm:$0xff] %vm1800_vm7, %v3085_v31 }
0x13db   : > { %v2951_v32 = vpop.f32.mrb[48].mxu0 }
0x13dc   : > { %v2958_v20 = vadd.f32 %v2951_v32, %v2327_v17  ;;  %v3657_v33 = vpop.f32.mrb[49].mxu0 }
0x13dd   : > { %v2954_v26 = vpop.f32.mrb[50].mxu0 }
0x13de   : > { %v2959_v35 = vadd.f32 %v2954_v26, %v2330_v15  ;;  %v3658_v36 = vpop.f32.mrb[51].mxu0  ;;  %v2968_v37 = vadd.f32 %v3391_v34, %v2958_v20 }
0x13e0   : > { %v2969_v28 = vadd.f32 %v3391_v34, %v2959_v35 }
0x13e2   : > { %v3008_v38 = vpack.c.bf16 %v2969_v28, %v2968_v37 }
0x13e4   : > { %3662 = vmatmul.mubr.msk.bf16.vlgmr.msra.gmra.mrb[52].mxu1 %vm1856_vm8, %v3008_v38 }
0x13e5   : > { %3924 = shalt.err (!%p3921_p11)
}
0x13e6   : > { %s3925_s0 = scalar_lea.hbm %s4561_s3, 256  ;;  %s3929_s12 = scalar_lea.hbm %s4169_s4, 512 }
0x13e7   : > { %p3926_p12 = scmp.ne.s32.totalorder %s4561_s3, %s3925_s0  ;;  %p3930_p1 = scmp.lt.u32.totalorder %s4561_s3, %s4169_s4 }
0x13e8   : > { %p3931_p2 = scmp.lt.u32.totalorder %s3929_s12, %s3925_s0  ;;  %p3933_p9 = scmp.lt.u32.totalorder %s3925_s0, %s4561_s3 }
0x13e9   : > { %p3927_p13 = pnand %p3926_p12, %p4210_p6 }
0x13ea   : > { %p3932_p3 = por %p3931_p2, %p3930_p1 }
0x13eb   : > { %p3928_p0 = pneg %p3927_p13 }
0x13ec   : > { %p3934_p5 = por %p3933_p9, %p3932_p3 }
0x13ee   : > { %p3935_p4 = pnand %p3934_p5, %p3928_p0 }
0x13f0   : > { %3938 = shalt.err (!%p3935_p4)
}
0x13f1   : > { %s4015_s8 = smov 128   ;;  %v3394_v7 = vld [vmem:[%s4159_s20] ss:$0 sm:$0xff] }
0x13f2   : > { %3665 = dma.vmem_to_hbm [thread:$0]  (%p4210_p6), %s4557_s14, 256, %s4561_s3, %s3096_s6, %s4015_s8, %s4015_s8, %s4698_s5  }
0x13f3   : > { %s4702_s5 = sshll.u32 %s4712_s2, 3 }
0x13f4   : > { %s1022_s9 = scalar_lea.vmem %s4164_s27, %s4702_s5 }
0x14b7   : > { %v3059_v11 = vpop.f32.mrb[52].mxu1 }
0x14b8   : > { %v3060_v39 = vadd.f32 %v3394_v7, %v3059_v11  ;;  %v3663_v42 = vpop.f32.mrb[53].mxu1 }
0x14b9   : > { %v3062_v44 = vpop.f32.mrb[54].mxu1 }
0x14ba   : > { %v3397_v47 = vmul.f32 -1.442695, %v3060_v39  ;;  %v3063_v49 = vadd.f32 %v3394_v7, %v3062_v44  ;;  %v3664_v51 = vpop.f32.mrb[55].mxu1 }
0x14bc   : > { %3903 = vpow2.f32 %v3397_v47  ;;  %v3398_v53 = vmul.f32 -1.442695, %v3063_v49 }
0x14be   : > { %3905 = vpow2.f32 %v3398_v53 }
0x14c6   : > { %v3904_v56 = vpop.eup %3903 }
0x14c7   : > { %v3072_v57 = vadd.f32 1.0, %v3904_v56 }
0x14c8   : > { %v3906_v59 = vpop.eup %3905 }
0x14c9   : > { %3907 = vrcp.f32 %v3072_v57  ;;  %v3073_v60 = vadd.f32 1.0, %v3906_v59 }
0x14cb   : > { %3909 = vrcp.f32 %v3073_v60 }
0x14d3   : > { %v3908_v61 = vpop.eup %3907 }
0x14d4   : > { %3078 = vst.msk [vmem:[%s1022_s9] sm:$0xff] %vm1066_vm4, %v3908_v61 }
0x14d5   : > { %v3910_v62 = vpop.eup %3909 }
0x14d6   : > { %3079 = vst.msk [vmem:[%s1022_s9 + $0x8] sm:$0xff] %vm1066_vm4, %v3910_v62 }
0x14d7 PF: > { %s3136_s3 = sand.u32 1, %s3961_s7   ;;  %p4703_p6 = scmp.ge.s32.totalorder %s3973_s15, 2 }
0x14d8   : > { %s3137_s6 = scalar_lea.sflag [#allocation4], %s3136_s3 }
0x14d9   : > { %p3668_p9 = pnand %p4703_p6, %p4214_p8 }
0x14db   : > { %3956 = dma.done.wait (!%p3668_p9), %s3137_s6, 256  }
0x14dc   : > { %3958 = vsyncadd (!%p3668_p9), %s3137_s6, 4294967040  ;;  %s4704_s28 = sld [smem:[#allocation31_spill]]  ;;  %p70_p7 = scmp.ge.s32.totalorder %s4196_s18, 4  }
0x14dd   : > { %s4705_s7 = smov %s3965_s10  ;;  %s4706_s10 = smov %s3969_s11 }
0x14de   : > { %s4708_s15 = smov %s4196_s18  ;;  %72 = sbr.rel (!%p70_p7) target bundleno = 66 (0x42), region = 274 }
0x14e2   : > { %s4707_s11 = smov %s4704_s28 }
0x14e5   :  { %3142 = vsyncpa [#allocation4], 1 }
0x14e6   :  { %3144 = vsyncpa [#allocation4 + $0x1], 1 }

</bundles_post_ra>
